<compile_context>
chip_gen: v7x
topology: tpu7x:2x2x1
jax: 0.10.0
libtpu: 0.0.40
codegen_flags: <defaults>
</compile_context>

<pallas_src>
import math
from functools import partial

import jax
import jax.numpy as jnp
from jax import lax
from jax.experimental import pallas as pl
from jax.experimental.pallas import tpu as pltpu  # noqa: F401  (kept for TPU-specific extensions)


# ---------------------------------------------------------------------------
# Fused Pallas kernel: all LSTM layers + dense head in one invocation
# ---------------------------------------------------------------------------
def _make_fused_kernel(T, B, nodes, O, mm_dtype):
    """Builds the fused kernel for a fixed static config.

    Ref order (as passed by pallas_call):
      inputs : x (T*B, F0)                             [mm_dtype]
               [w_ih (F_l, 4H_l), w_hh (H_l, 4H_l), b (1, 4H_l)] per LSTM layer l
               wd, bd   (dense head)
      outputs: y (T*B, O)                              [f32]
    Weights arrive pre-transposed, g-gate pre-scaled by 2, bias pre-summed (b_ih + b_hh).
    """
    L = len(nodes)

    def kernel(*refs):
        x_ref = refs[0]
        wd_ref = refs[1 + 3 * L]
        bd_ref = refs[2 + 3 * L]
        out_ref = refs[3 + 3 * L]

        src = x_ref[...]                                   # (T*B, F0), mm_dtype
        h_all = None
        for l in range(L):
            H = nodes[l]
            w_ih = refs[1 + 3 * l][...]                    # (F_l, 4H) mm_dtype
            w_hh = refs[2 + 3 * l][...]                    # (H,   4H) mm_dtype
            b = refs[3 + 3 * l][...]                       # (1,   4H) f32

            # Hoisted input projection: one MXU-efficient matmul over all T*B rows,
            # taken entirely off the sequential per-step dependent chain.
            gx = jnp.dot(src, w_ih, preferred_element_type=jnp.float32) + b  # (T*B, 4H) f32

            h = jnp.zeros((B, H), jnp.float32)
            c = jnp.zeros((B, H), jnp.float32)
            hs = []
            for t in range(T):                             # static, fully unrolled; no ref traffic
                gx_t = gx[t * B:(t + 1) * B, :]            # value slice, independent of h
                gates = gx_t + jnp.dot(h.astype(mm_dtype), w_hh,
                                       preferred_element_type=jnp.float32)  # (B, 4H) f32
                # Single full-vreg sigmoid; g-gate was pre-scaled by 2 so tanh = 2*sig - 1.
                s = jax.nn.sigmoid(gates)
                i_g = s[:, 0 * H:1 * H]
                f_g = s[:, 1 * H:2 * H]
                g_g = 2.0 * s[:, 2 * H:3 * H] - 1.0
                o_g = s[:, 3 * H:4 * H]
                c = f_g * c + i_g * g_g                    # f32 state math (v5e-safe)
                h = o_g * jnp.tanh(c)
                hs.append(h)

            # Materialize the layer output once (states stayed in registers until here).
            h_all = jnp.concatenate(hs, axis=0)            # (T*B, H) f32
            src = h_all.astype(mm_dtype)                   # feeds next layer's projection

        # Dense head.
        if O == 1:
            # O=1: VPU multiply + cross-lane reduce instead of a masked 1-lane MXU output.
            y = jnp.sum(h_all * wd_ref[...], axis=-1, keepdims=True) + bd_ref[...]
        else:
            y = jnp.dot(h_all.astype(mm_dtype), wd_ref[...],
                        preferred_element_type=jnp.float32) + bd_ref[...]
        out_ref[...] = y.astype(out_ref.dtype)

    return kernel


# ---------------------------------------------------------------------------
# Pallas wrapper
# ---------------------------------------------------------------------------
def lstm_stack_dense_pallas(kparams, x_btf):
    """x_btf: (B, T, F) f32. Returns dense(lstm_stack(x)) with shape (B, T, O)."""
    B, T, F = x_btf.shape
    nodes = [lw["w_hh"].shape[0] for lw in kparams["lstms"]]
    O = kparams["dense"]["b"].shape[1]
    mm_dtype = kparams["lstms"][0]["w_ih"].dtype           # weights already pre-cast

    # Time-major flattened input (row t*B + b == x[b, t]); pre-cast to the MXU dtype so the
    # kernel DMAs half the bytes and does no in-kernel input cast.
    x_flat = jnp.transpose(x_btf, (1, 0, 2)).reshape(T * B, F).astype(mm_dtype)

    in_arrays = [x_flat]
    in_specs = [pl.BlockSpec((T * B, F), lambda: (0, 0))]
    for lw in kparams["lstms"]:
        in_arrays += [lw["w_ih"], lw["w_hh"], lw["b"]]
        in_specs += [pl.BlockSpec(lw["w_ih"].shape, lambda: (0, 0)),
                     pl.BlockSpec(lw["w_hh"].shape, lambda: (0, 0)),
                     pl.BlockSpec(lw["b"].shape, lambda: (0, 0))]
    wd, bd = kparams["dense"]["w"], kparams["dense"]["b"]
    in_arrays += [wd, bd]
    in_specs += [pl.BlockSpec(wd.shape, lambda: (0, 0)),
                 pl.BlockSpec(bd.shape, lambda: (0, 0))]

    y_flat = pl.pallas_call(
        _make_fused_kernel(T, B, nodes, O, mm_dtype),
        out_shape=jax.ShapeDtypeStruct((T * B, O), jnp.float32),
        grid=(),                       # single invocation; whole model lives in VMEM
        in_specs=in_specs,
        out_specs=pl.BlockSpec((T * B, O), lambda: (0, 0)),
    )(*in_arrays)

    return jnp.transpose(y_flat.reshape(T, B, O), (1, 0, 2))   # (B, T, O)


def inf_base_lstm_forward(kparams, x_btf):
    """x_btf: (B, T, F). Returns squeeze(dense(lstm_stack(x))) — torch.squeeze semantics."""
    return jnp.squeeze(lstm_stack_dense_pallas(kparams, x_btf))


# ---------------------------------------------------------------------------
# Parameter init (PyTorch-style) + one-time conversion to the kernel layout
# ---------------------------------------------------------------------------
def init_raw_params(key, nodes, num_input_features, num_output_features):
    """Raw PyTorch-layout params: w_ih (4H,F), w_hh (4H,H), b_ih/b_hh (4H,), dense (O,H)/(O,)."""
    raw = {"lstms": [], "dense": None}
    input_sizes = [num_input_features] + list(nodes[:-1])
    for H, F in zip(nodes, input_sizes):
        key, k1, k2, k3, k4 = jax.random.split(key, 5)
        bound = 1.0 / math.sqrt(H)
        raw["lstms"].append({
            "w_ih": jax.random.uniform(k1, (4 * H, F), jnp.float32, -bound, bound),
            "w_hh": jax.random.uniform(k2, (4 * H, H), jnp.float32, -bound, bound),
            "b_ih": jax.random.uniform(k3, (4 * H,), jnp.float32, -bound, bound),
            "b_hh": jax.random.uniform(k4, (4 * H,), jnp.float32, -bound, bound),
        })
    key, kd1, kd2 = jax.random.split(key, 3)
    Hl = nodes[-1]
    bound = 1.0 / math.sqrt(Hl)
    raw["dense"] = {
        "w": jax.random.uniform(kd1, (num_output_features, Hl), jnp.float32, -bound, bound),
        "b": jax.random.uniform(kd2, (num_output_features,), jnp.float32, -bound, bound),
    }
    return raw


def prepare_params(raw, matmul_dtype=jnp.bfloat16):
    """One-time conversion to the kernel layout.

    Per layer: W_ih^T (F,4H) and W_hh^T (H,4H) in `matmul_dtype`, combined bias (1,4H) f32.
    The g-gate (third) block of the weights and bias is pre-scaled by 2 so the kernel can use
    tanh(z) = 2*sigmoid(2z) - 1 with one full-width sigmoid (the x2 is exact in bf16).
    Dense head: O==1 -> (1, H) f32 row for the VPU reduce; else (H, O) matmul_dtype.
    """
    kp = {"lstms": [], "dense": None}
    for lw in raw["lstms"]:
        w_ih, w_hh = lw["w_ih"], lw["w_hh"]
        H = w_hh.shape[1]
        b = lw["b_ih"] + lw["b_hh"]
        scale = jnp.concatenate([jnp.ones((2 * H,), jnp.float32),
                                 jnp.full((H,), 2.0, jnp.float32),
                                 jnp.ones((H,), jnp.float32)])
        kp["lstms"].append({
            "w_ih": jnp.transpose(w_ih * scale[:, None]).astype(matmul_dtype),   # (F, 4H)
            "w_hh": jnp.transpose(w_hh * scale[:, None]).astype(matmul_dtype),   # (H, 4H)
            "b": (b * scale).reshape(1, 4 * H).astype(jnp.float32),
        })
    w_d, b_d = raw["dense"]["w"], raw["dense"]["b"]
    O = w_d.shape[0]
    if O == 1:
        kp["dense"] = {"w": w_d.astype(jnp.float32),                 # (1, H) row, VPU reduce
                       "b": b_d.reshape(1, 1).astype(jnp.float32)}
    else:
        kp["dense"] = {"w": jnp.transpose(w_d).astype(matmul_dtype),  # (H, O)
                       "b": b_d.reshape(1, O).astype(jnp.float32)}
    return kp


# ---------------------------------------------------------------------------
# Pure-JAX reference (exact f32 math, PyTorch gate order) for sanity checks
# ---------------------------------------------------------------------------
def _reference_forward(raw, x_btf):
    dot = partial(jnp.dot, precision=lax.Precision.HIGHEST)
    h_seq = x_btf
    for lw in raw["lstms"]:
        w_ih, w_hh = lw["w_ih"], lw["w_hh"]
        b = lw["b_ih"] + lw["b_hh"]
        H = w_hh.shape[1]
        Bsz, Tlen, _ = h_seq.shape
        h_t = jnp.zeros((Bsz, H), jnp.float32)
        c_t = jnp.zeros((Bsz, H), jnp.float32)
        outs = []
        for t in range(Tlen):
            gates = dot(h_seq[:, t, :], w_ih.T) + dot(h_t, w_hh.T) + b
            i_g = jax.nn.sigmoid(gates[:, 0 * H:1 * H])
            f_g = jax.nn.sigmoid(gates[:, 1 * H:2 * H])
            g_g = jnp.tanh(gates[:, 2 * H:3 * H])
            o_g = jax.nn.sigmoid(gates[:, 3 * H:4 * H])
            c_t = f_g * c_t + i_g * g_g
            h_t = o_g * jnp.tanh(c_t)
            outs.append(h_t)
        h_seq = jnp.stack(outs, axis=1)
    y = dot(h_seq, raw["dense"]["w"].T) + raw["dense"]["b"]
    return jnp.squeeze(y)


# ---------------------------------------------------------------------------
if __name__ == "__main__":
    # Small config consistent with the module: 2 LSTM layers (H=32) then Linear(32, 1).
    B, T, F = 2, 8, 16
    nodes = [32, 32]
    num_output_features = 1

    key = jax.random.PRNGKey(0)
    key, kx = jax.random.split(key)
    x = jax.random.normal(kx, (B, T, F), dtype=jnp.float32)
    raw_params = init_raw_params(key, nodes, F, num_output_features)

    fwd = jax.jit(inf_base_lstm_forward)

    # Perf-default path: bf16 MXU operands, f32 accumulation / state math.
    kp_bf16 = prepare_params(raw_params, jnp.bfloat16)
    out = jax.block_until_ready(fwd(kp_bf16, x))
    assert out.shape == (B, T), f"unexpected output shape {out.shape}"
    assert bool(jnp.all(jnp.isfinite(out)))

    ref = jax.block_until_ready(_reference_forward(raw_params, x))

    # Exact-f32 matmul path: tight numerical check against pure JAX.
    kp_f32 = prepare_params(raw_params, jnp.float32)
    out_f32 = jax.block_until_ready(fwd(kp_f32, x))
    assert bool(jnp.allclose(out_f32, ref, atol=2e-3, rtol=2e-3)), \
        f"f32 path max abs err {float(jnp.max(jnp.abs(out_f32 - ref)))}"

    # bf16 path: loose tolerance check (rounding compounds over the recurrence).
    assert bool(jnp.allclose(out, ref, atol=5e-2, rtol=5e-2)), \
        f"bf16 path max abs err {float(jnp.max(jnp.abs(out - ref)))}"

    print("KERNEL_OK")
</pallas_src>

<mosaic_0001>
module attributes {stable_mosaic.version = 11 : i64} {
  func.func @kernel(%arg0: memref<16x16xbf16, #tpu.memory_space<vmem>>, %arg1: memref<16x128xbf16, #tpu.memory_space<vmem>>, %arg2: memref<32x128xbf16, #tpu.memory_space<vmem>>, %arg3: memref<1x128xf32, #tpu.memory_space<vmem>>, %arg4: memref<32x128xbf16, #tpu.memory_space<vmem>>, %arg5: memref<32x128xbf16, #tpu.memory_space<vmem>>, %arg6: memref<1x128xf32, #tpu.memory_space<vmem>>, %arg7: memref<1x32xf32, #tpu.memory_space<vmem>>, %arg8: memref<1x1xf32, #tpu.memory_space<vmem>>, %arg9: memref<16x1xf32, #tpu.memory_space<vmem>>) attributes {dimension_semantics = [], scalar_prefetch = 0 : i64, scratch_operands = 0 : i64, tpu.core_type = #tpu.core_type<tc>} {
    %c0 = arith.constant 0 : index
    %c0_0 = arith.constant 0 : index
    %0 = vector.load %arg0[%c0, %c0_0] : memref<16x16xbf16, #tpu.memory_space<vmem>>, vector<16x16xbf16>
    %c0_1 = arith.constant 0 : index
    %c0_2 = arith.constant 0 : index
    %1 = vector.load %arg1[%c0_1, %c0_2] : memref<16x128xbf16, #tpu.memory_space<vmem>>, vector<16x128xbf16>
    %c0_3 = arith.constant 0 : index
    %c0_4 = arith.constant 0 : index
    %2 = vector.load %arg2[%c0_3, %c0_4] : memref<32x128xbf16, #tpu.memory_space<vmem>>, vector<32x128xbf16>
    %c0_5 = arith.constant 0 : index
    %c0_6 = arith.constant 0 : index
    %3 = vector.load %arg3[%c0_5, %c0_6] : memref<1x128xf32, #tpu.memory_space<vmem>>, vector<1x128xf32>
    %cst = arith.constant dense<0.000000e+00> : vector<16x128xf32>
    %4 = tpu.matmul %0, %1, %cst {dimension_numbers = #tpu.dot_dimension_numbers<[1], [0], [0], [1], [0, 0, 1, 1], [], []>} : vector<16x16xbf16>, vector<16x128xbf16>, vector<16x128xf32> -> vector<16x128xf32>
    %5 = vector.broadcast %3 : vector<1x128xf32> to vector<16x128xf32>
    %6 = arith.addf %4, %5 : vector<16x128xf32>
    %cst_7 = arith.constant 0.000000e+00 : f32
    %7 = vector.broadcast %cst_7 : f32 to vector<2x32xf32>
    %cst_8 = arith.constant 0.000000e+00 : f32
    %8 = vector.broadcast %cst_8 : f32 to vector<2x32xf32>
    %9 = vector.extract_strided_slice %6 {offsets = [0, 0], sizes = [2, 128], strides = [1, 1]} : vector<16x128xf32> to vector<2x128xf32>
    %10 = arith.truncf %7 : vector<2x32xf32> to vector<2x32xbf16>
    %cst_9 = arith.constant dense<0.000000e+00> : vector<2x128xf32>
    %11 = tpu.matmul %10, %2, %cst_9 {dimension_numbers = #tpu.dot_dimension_numbers<[1], [0], [0], [1], [0, 0, 1, 1], [], []>} : vector<2x32xbf16>, vector<32x128xbf16>, vector<2x128xf32> -> vector<2x128xf32>
    %12 = arith.addf %9, %11 : vector<2x128xf32>
    %13 = arith.negf %12 : vector<2x128xf32>
    %14 = math.exp %13 : vector<2x128xf32>
    %cst_10 = arith.constant 1.000000e+00 : f32
    %15 = vector.broadcast %cst_10 : f32 to vector<2x128xf32>
    %16 = arith.addf %15, %14 : vector<2x128xf32>
    %17 = arith.divf %15, %16 : vector<2x128xf32>
    %18 = vector.extract_strided_slice %17 {offsets = [0, 0], sizes = [2, 32], strides = [1, 1]} : vector<2x128xf32> to vector<2x32xf32>
    %19 = vector.extract_strided_slice %17 {offsets = [0, 32], sizes = [2, 32], strides = [1, 1]} : vector<2x128xf32> to vector<2x32xf32>
    %20 = vector.extract_strided_slice %17 {offsets = [0, 64], sizes = [2, 32], strides = [1, 1]} : vector<2x128xf32> to vector<2x32xf32>
    %cst_11 = arith.constant 2.000000e+00 : f32
    %21 = vector.broadcast %cst_11 : f32 to vector<2x32xf32>
    %22 = arith.mulf %21, %20 : vector<2x32xf32>
    %cst_12 = arith.constant 1.000000e+00 : f32
    %23 = vector.broadcast %cst_12 : f32 to vector<2x32xf32>
    %24 = arith.subf %22, %23 : vector<2x32xf32>
    %25 = vector.extract_strided_slice %17 {offsets = [0, 96], sizes = [2, 32], strides = [1, 1]} : vector<2x128xf32> to vector<2x32xf32>
    %26 = arith.mulf %19, %8 : vector<2x32xf32>
    %27 = arith.mulf %18, %24 : vector<2x32xf32>
    %28 = arith.addf %26, %27 : vector<2x32xf32>
    %29 = math.tanh %28 : vector<2x32xf32>
    %30 = arith.mulf %25, %29 : vector<2x32xf32>
    %31 = vector.extract_strided_slice %6 {offsets = [2, 0], sizes = [2, 128], strides = [1, 1]} : vector<16x128xf32> to vector<2x128xf32>
    %32 = arith.truncf %30 : vector<2x32xf32> to vector<2x32xbf16>
    %cst_13 = arith.constant dense<0.000000e+00> : vector<2x128xf32>
    %33 = tpu.matmul %32, %2, %cst_13 {dimension_numbers = #tpu.dot_dimension_numbers<[1], [0], [0], [1], [0, 0, 1, 1], [], []>} : vector<2x32xbf16>, vector<32x128xbf16>, vector<2x128xf32> -> vector<2x128xf32>
    %34 = arith.addf %31, %33 : vector<2x128xf32>
    %35 = arith.negf %34 : vector<2x128xf32>
    %36 = math.exp %35 : vector<2x128xf32>
    %cst_14 = arith.constant 1.000000e+00 : f32
    %37 = vector.broadcast %cst_14 : f32 to vector<2x128xf32>
    %38 = arith.addf %37, %36 : vector<2x128xf32>
    %39 = arith.divf %37, %38 : vector<2x128xf32>
    %40 = vector.extract_strided_slice %39 {offsets = [0, 0], sizes = [2, 32], strides = [1, 1]} : vector<2x128xf32> to vector<2x32xf32>
    %41 = vector.extract_strided_slice %39 {offsets = [0, 32], sizes = [2, 32], strides = [1, 1]} : vector<2x128xf32> to vector<2x32xf32>
    %42 = vector.extract_strided_slice %39 {offsets = [0, 64], sizes = [2, 32], strides = [1, 1]} : vector<2x128xf32> to vector<2x32xf32>
    %cst_15 = arith.constant 2.000000e+00 : f32
    %43 = vector.broadcast %cst_15 : f32 to vector<2x32xf32>
    %44 = arith.mulf %43, %42 : vector<2x32xf32>
    %cst_16 = arith.constant 1.000000e+00 : f32
    %45 = vector.broadcast %cst_16 : f32 to vector<2x32xf32>
    %46 = arith.subf %44, %45 : vector<2x32xf32>
    %47 = vector.extract_strided_slice %39 {offsets = [0, 96], sizes = [2, 32], strides = [1, 1]} : vector<2x128xf32> to vector<2x32xf32>
    %48 = arith.mulf %41, %28 : vector<2x32xf32>
    %49 = arith.mulf %40, %46 : vector<2x32xf32>
    %50 = arith.addf %48, %49 : vector<2x32xf32>
    %51 = math.tanh %50 : vector<2x32xf32>
    %52 = arith.mulf %47, %51 : vector<2x32xf32>
    %53 = vector.extract_strided_slice %6 {offsets = [4, 0], sizes = [2, 128], strides = [1, 1]} : vector<16x128xf32> to vector<2x128xf32>
    %54 = arith.truncf %52 : vector<2x32xf32> to vector<2x32xbf16>
    %cst_17 = arith.constant dense<0.000000e+00> : vector<2x128xf32>
    %55 = tpu.matmul %54, %2, %cst_17 {dimension_numbers = #tpu.dot_dimension_numbers<[1], [0], [0], [1], [0, 0, 1, 1], [], []>} : vector<2x32xbf16>, vector<32x128xbf16>, vector<2x128xf32> -> vector<2x128xf32>
    %56 = arith.addf %53, %55 : vector<2x128xf32>
    %57 = arith.negf %56 : vector<2x128xf32>
    %58 = math.exp %57 : vector<2x128xf32>
    %cst_18 = arith.constant 1.000000e+00 : f32
    %59 = vector.broadcast %cst_18 : f32 to vector<2x128xf32>
    %60 = arith.addf %59, %58 : vector<2x128xf32>
    %61 = arith.divf %59, %60 : vector<2x128xf32>
    %62 = vector.extract_strided_slice %61 {offsets = [0, 0], sizes = [2, 32], strides = [1, 1]} : vector<2x128xf32> to vector<2x32xf32>
    %63 = vector.extract_strided_slice %61 {offsets = [0, 32], sizes = [2, 32], strides = [1, 1]} : vector<2x128xf32> to vector<2x32xf32>
    %64 = vector.extract_strided_slice %61 {offsets = [0, 64], sizes = [2, 32], strides = [1, 1]} : vector<2x128xf32> to vector<2x32xf32>
    %cst_19 = arith.constant 2.000000e+00 : f32
    %65 = vector.broadcast %cst_19 : f32 to vector<2x32xf32>
    %66 = arith.mulf %65, %64 : vector<2x32xf32>
    %cst_20 = arith.constant 1.000000e+00 : f32
    %67 = vector.broadcast %cst_20 : f32 to vector<2x32xf32>
    %68 = arith.subf %66, %67 : vector<2x32xf32>
    %69 = vector.extract_strided_slice %61 {offsets = [0, 96], sizes = [2, 32], strides = [1, 1]} : vector<2x128xf32> to vector<2x32xf32>
    %70 = arith.mulf %63, %50 : vector<2x32xf32>
    %71 = arith.mulf %62, %68 : vector<2x32xf32>
    %72 = arith.addf %70, %71 : vector<2x32xf32>
    %73 = math.tanh %72 : vector<2x32xf32>
    %74 = arith.mulf %69, %73 : vector<2x32xf32>
    %75 = vector.extract_strided_slice %6 {offsets = [6, 0], sizes = [2, 128], strides = [1, 1]} : vector<16x128xf32> to vector<2x128xf32>
    %76 = arith.truncf %74 : vector<2x32xf32> to vector<2x32xbf16>
    %cst_21 = arith.constant dense<0.000000e+00> : vector<2x128xf32>
    %77 = tpu.matmul %76, %2, %cst_21 {dimension_numbers = #tpu.dot_dimension_numbers<[1], [0], [0], [1], [0, 0, 1, 1], [], []>} : vector<2x32xbf16>, vector<32x128xbf16>, vector<2x128xf32> -> vector<2x128xf32>
    %78 = arith.addf %75, %77 : vector<2x128xf32>
    %79 = arith.negf %78 : vector<2x128xf32>
    %80 = math.exp %79 : vector<2x128xf32>
    %cst_22 = arith.constant 1.000000e+00 : f32
    %81 = vector.broadcast %cst_22 : f32 to vector<2x128xf32>
    %82 = arith.addf %81, %80 : vector<2x128xf32>
    %83 = arith.divf %81, %82 : vector<2x128xf32>
    %84 = vector.extract_strided_slice %83 {offsets = [0, 0], sizes = [2, 32], strides = [1, 1]} : vector<2x128xf32> to vector<2x32xf32>
    %85 = vector.extract_strided_slice %83 {offsets = [0, 32], sizes = [2, 32], strides = [1, 1]} : vector<2x128xf32> to vector<2x32xf32>
    %86 = vector.extract_strided_slice %83 {offsets = [0, 64], sizes = [2, 32], strides = [1, 1]} : vector<2x128xf32> to vector<2x32xf32>
    %cst_23 = arith.constant 2.000000e+00 : f32
    %87 = vector.broadcast %cst_23 : f32 to vector<2x32xf32>
    %88 = arith.mulf %87, %86 : vector<2x32xf32>
    %cst_24 = arith.constant 1.000000e+00 : f32
    %89 = vector.broadcast %cst_24 : f32 to vector<2x32xf32>
    %90 = arith.subf %88, %89 : vector<2x32xf32>
    %91 = vector.extract_strided_slice %83 {offsets = [0, 96], sizes = [2, 32], strides = [1, 1]} : vector<2x128xf32> to vector<2x32xf32>
    %92 = arith.mulf %85, %72 : vector<2x32xf32>
    %93 = arith.mulf %84, %90 : vector<2x32xf32>
    %94 = arith.addf %92, %93 : vector<2x32xf32>
    %95 = math.tanh %94 : vector<2x32xf32>
    %96 = arith.mulf %91, %95 : vector<2x32xf32>
    %97 = vector.extract_strided_slice %6 {offsets = [8, 0], sizes = [2, 128], strides = [1, 1]} : vector<16x128xf32> to vector<2x128xf32>
    %98 = arith.truncf %96 : vector<2x32xf32> to vector<2x32xbf16>
    %cst_25 = arith.constant dense<0.000000e+00> : vector<2x128xf32>
    %99 = tpu.matmul %98, %2, %cst_25 {dimension_numbers = #tpu.dot_dimension_numbers<[1], [0], [0], [1], [0, 0, 1, 1], [], []>} : vector<2x32xbf16>, vector<32x128xbf16>, vector<2x128xf32> -> vector<2x128xf32>
    %100 = arith.addf %97, %99 : vector<2x128xf32>
    %101 = arith.negf %100 : vector<2x128xf32>
    %102 = math.exp %101 : vector<2x128xf32>
    %cst_26 = arith.constant 1.000000e+00 : f32
    %103 = vector.broadcast %cst_26 : f32 to vector<2x128xf32>
    %104 = arith.addf %103, %102 : vector<2x128xf32>
    %105 = arith.divf %103, %104 : vector<2x128xf32>
    %106 = vector.extract_strided_slice %105 {offsets = [0, 0], sizes = [2, 32], strides = [1, 1]} : vector<2x128xf32> to vector<2x32xf32>
    %107 = vector.extract_strided_slice %105 {offsets = [0, 32], sizes = [2, 32], strides = [1, 1]} : vector<2x128xf32> to vector<2x32xf32>
    %108 = vector.extract_strided_slice %105 {offsets = [0, 64], sizes = [2, 32], strides = [1, 1]} : vector<2x128xf32> to vector<2x32xf32>
    %cst_27 = arith.constant 2.000000e+00 : f32
    %109 = vector.broadcast %cst_27 : f32 to vector<2x32xf32>
    %110 = arith.mulf %109, %108 : vector<2x32xf32>
    %cst_28 = arith.constant 1.000000e+00 : f32
    %111 = vector.broadcast %cst_28 : f32 to vector<2x32xf32>
    %112 = arith.subf %110, %111 : vector<2x32xf32>
    %113 = vector.extract_strided_slice %105 {offsets = [0, 96], sizes = [2, 32], strides = [1, 1]} : vector<2x128xf32> to vector<2x32xf32>
    %114 = arith.mulf %107, %94 : vector<2x32xf32>
    %115 = arith.mulf %106, %112 : vector<2x32xf32>
    %116 = arith.addf %114, %115 : vector<2x32xf32>
    %117 = math.tanh %116 : vector<2x32xf32>
    %118 = arith.mulf %113, %117 : vector<2x32xf32>
    %119 = vector.extract_strided_slice %6 {offsets = [10, 0], sizes = [2, 128], strides = [1, 1]} : vector<16x128xf32> to vector<2x128xf32>
    %120 = arith.truncf %118 : vector<2x32xf32> to vector<2x32xbf16>
    %cst_29 = arith.constant dense<0.000000e+00> : vector<2x128xf32>
    %121 = tpu.matmul %120, %2, %cst_29 {dimension_numbers = #tpu.dot_dimension_numbers<[1], [0], [0], [1], [0, 0, 1, 1], [], []>} : vector<2x32xbf16>, vector<32x128xbf16>, vector<2x128xf32> -> vector<2x128xf32>
    %122 = arith.addf %119, %121 : vector<2x128xf32>
    %123 = arith.negf %122 : vector<2x128xf32>
    %124 = math.exp %123 : vector<2x128xf32>
    %cst_30 = arith.constant 1.000000e+00 : f32
    %125 = vector.broadcast %cst_30 : f32 to vector<2x128xf32>
    %126 = arith.addf %125, %124 : vector<2x128xf32>
    %127 = arith.divf %125, %126 : vector<2x128xf32>
    %128 = vector.extract_strided_slice %127 {offsets = [0, 0], sizes = [2, 32], strides = [1, 1]} : vector<2x128xf32> to vector<2x32xf32>
    %129 = vector.extract_strided_slice %127 {offsets = [0, 32], sizes = [2, 32], strides = [1, 1]} : vector<2x128xf32> to vector<2x32xf32>
    %130 = vector.extract_strided_slice %127 {offsets = [0, 64], sizes = [2, 32], strides = [1, 1]} : vector<2x128xf32> to vector<2x32xf32>
    %cst_31 = arith.constant 2.000000e+00 : f32
    %131 = vector.broadcast %cst_31 : f32 to vector<2x32xf32>
    %132 = arith.mulf %131, %130 : vector<2x32xf32>
    %cst_32 = arith.constant 1.000000e+00 : f32
    %133 = vector.broadcast %cst_32 : f32 to vector<2x32xf32>
    %134 = arith.subf %132, %133 : vector<2x32xf32>
    %135 = vector.extract_strided_slice %127 {offsets = [0, 96], sizes = [2, 32], strides = [1, 1]} : vector<2x128xf32> to vector<2x32xf32>
    %136 = arith.mulf %129, %116 : vector<2x32xf32>
    %137 = arith.mulf %128, %134 : vector<2x32xf32>
    %138 = arith.addf %136, %137 : vector<2x32xf32>
    %139 = math.tanh %138 : vector<2x32xf32>
    %140 = arith.mulf %135, %139 : vector<2x32xf32>
    %141 = vector.extract_strided_slice %6 {offsets = [12, 0], sizes = [2, 128], strides = [1, 1]} : vector<16x128xf32> to vector<2x128xf32>
    %142 = arith.truncf %140 : vector<2x32xf32> to vector<2x32xbf16>
    %cst_33 = arith.constant dense<0.000000e+00> : vector<2x128xf32>
    %143 = tpu.matmul %142, %2, %cst_33 {dimension_numbers = #tpu.dot_dimension_numbers<[1], [0], [0], [1], [0, 0, 1, 1], [], []>} : vector<2x32xbf16>, vector<32x128xbf16>, vector<2x128xf32> -> vector<2x128xf32>
    %144 = arith.addf %141, %143 : vector<2x128xf32>
    %145 = arith.negf %144 : vector<2x128xf32>
    %146 = math.exp %145 : vector<2x128xf32>
    %cst_34 = arith.constant 1.000000e+00 : f32
    %147 = vector.broadcast %cst_34 : f32 to vector<2x128xf32>
    %148 = arith.addf %147, %146 : vector<2x128xf32>
    %149 = arith.divf %147, %148 : vector<2x128xf32>
    %150 = vector.extract_strided_slice %149 {offsets = [0, 0], sizes = [2, 32], strides = [1, 1]} : vector<2x128xf32> to vector<2x32xf32>
    %151 = vector.extract_strided_slice %149 {offsets = [0, 32], sizes = [2, 32], strides = [1, 1]} : vector<2x128xf32> to vector<2x32xf32>
    %152 = vector.extract_strided_slice %149 {offsets = [0, 64], sizes = [2, 32], strides = [1, 1]} : vector<2x128xf32> to vector<2x32xf32>
    %cst_35 = arith.constant 2.000000e+00 : f32
    %153 = vector.broadcast %cst_35 : f32 to vector<2x32xf32>
    %154 = arith.mulf %153, %152 : vector<2x32xf32>
    %cst_36 = arith.constant 1.000000e+00 : f32
    %155 = vector.broadcast %cst_36 : f32 to vector<2x32xf32>
    %156 = arith.subf %154, %155 : vector<2x32xf32>
    %157 = vector.extract_strided_slice %149 {offsets = [0, 96], sizes = [2, 32], strides = [1, 1]} : vector<2x128xf32> to vector<2x32xf32>
    %158 = arith.mulf %151, %138 : vector<2x32xf32>
    %159 = arith.mulf %150, %156 : vector<2x32xf32>
    %160 = arith.addf %158, %159 : vector<2x32xf32>
    %161 = math.tanh %160 : vector<2x32xf32>
    %162 = arith.mulf %157, %161 : vector<2x32xf32>
    %163 = vector.extract_strided_slice %6 {offsets = [14, 0], sizes = [2, 128], strides = [1, 1]} : vector<16x128xf32> to vector<2x128xf32>
    %164 = arith.truncf %162 : vector<2x32xf32> to vector<2x32xbf16>
    %cst_37 = arith.constant dense<0.000000e+00> : vector<2x128xf32>
    %165 = tpu.matmul %164, %2, %cst_37 {dimension_numbers = #tpu.dot_dimension_numbers<[1], [0], [0], [1], [0, 0, 1, 1], [], []>} : vector<2x32xbf16>, vector<32x128xbf16>, vector<2x128xf32> -> vector<2x128xf32>
    %166 = arith.addf %163, %165 : vector<2x128xf32>
    %167 = arith.negf %166 : vector<2x128xf32>
    %168 = math.exp %167 : vector<2x128xf32>
    %cst_38 = arith.constant 1.000000e+00 : f32
    %169 = vector.broadcast %cst_38 : f32 to vector<2x128xf32>
    %170 = arith.addf %169, %168 : vector<2x128xf32>
    %171 = arith.divf %169, %170 : vector<2x128xf32>
    %172 = vector.extract_strided_slice %171 {offsets = [0, 0], sizes = [2, 32], strides = [1, 1]} : vector<2x128xf32> to vector<2x32xf32>
    %173 = vector.extract_strided_slice %171 {offsets = [0, 32], sizes = [2, 32], strides = [1, 1]} : vector<2x128xf32> to vector<2x32xf32>
    %174 = vector.extract_strided_slice %171 {offsets = [0, 64], sizes = [2, 32], strides = [1, 1]} : vector<2x128xf32> to vector<2x32xf32>
    %cst_39 = arith.constant 2.000000e+00 : f32
    %175 = vector.broadcast %cst_39 : f32 to vector<2x32xf32>
    %176 = arith.mulf %175, %174 : vector<2x32xf32>
    %cst_40 = arith.constant 1.000000e+00 : f32
    %177 = vector.broadcast %cst_40 : f32 to vector<2x32xf32>
    %178 = arith.subf %176, %177 : vector<2x32xf32>
    %179 = vector.extract_strided_slice %171 {offsets = [0, 96], sizes = [2, 32], strides = [1, 1]} : vector<2x128xf32> to vector<2x32xf32>
    %180 = arith.mulf %173, %160 : vector<2x32xf32>
    %181 = arith.mulf %172, %178 : vector<2x32xf32>
    %182 = arith.addf %180, %181 : vector<2x32xf32>
    %183 = math.tanh %182 : vector<2x32xf32>
    %184 = arith.mulf %179, %183 : vector<2x32xf32>
    %185 = tpu.concatenate %30, %52, %74, %96, %118, %140, %162, %184 in 0 : vector<2x32xf32>, vector<2x32xf32>, vector<2x32xf32>, vector<2x32xf32>, vector<2x32xf32>, vector<2x32xf32>, vector<2x32xf32>, vector<2x32xf32> -> vector<16x32xf32>
    %186 = arith.truncf %185 : vector<16x32xf32> to vector<16x32xbf16>
    %c0_41 = arith.constant 0 : index
    %c0_42 = arith.constant 0 : index
    %187 = vector.load %arg4[%c0_41, %c0_42] : memref<32x128xbf16, #tpu.memory_space<vmem>>, vector<32x128xbf16>
    %c0_43 = arith.constant 0 : index
    %c0_44 = arith.constant 0 : index
    %188 = vector.load %arg5[%c0_43, %c0_44] : memref<32x128xbf16, #tpu.memory_space<vmem>>, vector<32x128xbf16>
    %c0_45 = arith.constant 0 : index
    %c0_46 = arith.constant 0 : index
    %189 = vector.load %arg6[%c0_45, %c0_46] : memref<1x128xf32, #tpu.memory_space<vmem>>, vector<1x128xf32>
    %cst_47 = arith.constant dense<0.000000e+00> : vector<16x128xf32>
    %190 = tpu.matmul %186, %187, %cst_47 {dimension_numbers = #tpu.dot_dimension_numbers<[1], [0], [0], [1], [0, 0, 1, 1], [], []>} : vector<16x32xbf16>, vector<32x128xbf16>, vector<16x128xf32> -> vector<16x128xf32>
    %191 = vector.broadcast %189 : vector<1x128xf32> to vector<16x128xf32>
    %192 = arith.addf %190, %191 : vector<16x128xf32>
    %cst_48 = arith.constant 0.000000e+00 : f32
    %193 = vector.broadcast %cst_48 : f32 to vector<2x32xf32>
    %cst_49 = arith.constant 0.000000e+00 : f32
    %194 = vector.broadcast %cst_49 : f32 to vector<2x32xf32>
    %195 = vector.extract_strided_slice %192 {offsets = [0, 0], sizes = [2, 128], strides = [1, 1]} : vector<16x128xf32> to vector<2x128xf32>
    %196 = arith.truncf %193 : vector<2x32xf32> to vector<2x32xbf16>
    %cst_50 = arith.constant dense<0.000000e+00> : vector<2x128xf32>
    %197 = tpu.matmul %196, %188, %cst_50 {dimension_numbers = #tpu.dot_dimension_numbers<[1], [0], [0], [1], [0, 0, 1, 1], [], []>} : vector<2x32xbf16>, vector<32x128xbf16>, vector<2x128xf32> -> vector<2x128xf32>
    %198 = arith.addf %195, %197 : vector<2x128xf32>
    %199 = arith.negf %198 : vector<2x128xf32>
    %200 = math.exp %199 : vector<2x128xf32>
    %cst_51 = arith.constant 1.000000e+00 : f32
    %201 = vector.broadcast %cst_51 : f32 to vector<2x128xf32>
    %202 = arith.addf %201, %200 : vector<2x128xf32>
    %203 = arith.divf %201, %202 : vector<2x128xf32>
    %204 = vector.extract_strided_slice %203 {offsets = [0, 0], sizes = [2, 32], strides = [1, 1]} : vector<2x128xf32> to vector<2x32xf32>
    %205 = vector.extract_strided_slice %203 {offsets = [0, 32], sizes = [2, 32], strides = [1, 1]} : vector<2x128xf32> to vector<2x32xf32>
    %206 = vector.extract_strided_slice %203 {offsets = [0, 64], sizes = [2, 32], strides = [1, 1]} : vector<2x128xf32> to vector<2x32xf32>
    %cst_52 = arith.constant 2.000000e+00 : f32
    %207 = vector.broadcast %cst_52 : f32 to vector<2x32xf32>
    %208 = arith.mulf %207, %206 : vector<2x32xf32>
    %cst_53 = arith.constant 1.000000e+00 : f32
    %209 = vector.broadcast %cst_53 : f32 to vector<2x32xf32>
    %210 = arith.subf %208, %209 : vector<2x32xf32>
    %211 = vector.extract_strided_slice %203 {offsets = [0, 96], sizes = [2, 32], strides = [1, 1]} : vector<2x128xf32> to vector<2x32xf32>
    %212 = arith.mulf %205, %194 : vector<2x32xf32>
    %213 = arith.mulf %204, %210 : vector<2x32xf32>
    %214 = arith.addf %212, %213 : vector<2x32xf32>
    %215 = math.tanh %214 : vector<2x32xf32>
    %216 = arith.mulf %211, %215 : vector<2x32xf32>
    %217 = vector.extract_strided_slice %192 {offsets = [2, 0], sizes = [2, 128], strides = [1, 1]} : vector<16x128xf32> to vector<2x128xf32>
    %218 = arith.truncf %216 : vector<2x32xf32> to vector<2x32xbf16>
    %cst_54 = arith.constant dense<0.000000e+00> : vector<2x128xf32>
    %219 = tpu.matmul %218, %188, %cst_54 {dimension_numbers = #tpu.dot_dimension_numbers<[1], [0], [0], [1], [0, 0, 1, 1], [], []>} : vector<2x32xbf16>, vector<32x128xbf16>, vector<2x128xf32> -> vector<2x128xf32>
    %220 = arith.addf %217, %219 : vector<2x128xf32>
    %221 = arith.negf %220 : vector<2x128xf32>
    %222 = math.exp %221 : vector<2x128xf32>
    %cst_55 = arith.constant 1.000000e+00 : f32
    %223 = vector.broadcast %cst_55 : f32 to vector<2x128xf32>
    %224 = arith.addf %223, %222 : vector<2x128xf32>
    %225 = arith.divf %223, %224 : vector<2x128xf32>
    %226 = vector.extract_strided_slice %225 {offsets = [0, 0], sizes = [2, 32], strides = [1, 1]} : vector<2x128xf32> to vector<2x32xf32>
    %227 = vector.extract_strided_slice %225 {offsets = [0, 32], sizes = [2, 32], strides = [1, 1]} : vector<2x128xf32> to vector<2x32xf32>
    %228 = vector.extract_strided_slice %225 {offsets = [0, 64], sizes = [2, 32], strides = [1, 1]} : vector<2x128xf32> to vector<2x32xf32>
    %cst_56 = arith.constant 2.000000e+00 : f32
    %229 = vector.broadcast %cst_56 : f32 to vector<2x32xf32>
    %230 = arith.mulf %229, %228 : vector<2x32xf32>
    %cst_57 = arith.constant 1.000000e+00 : f32
    %231 = vector.broadcast %cst_57 : f32 to vector<2x32xf32>
    %232 = arith.subf %230, %231 : vector<2x32xf32>
    %233 = vector.extract_strided_slice %225 {offsets = [0, 96], sizes = [2, 32], strides = [1, 1]} : vector<2x128xf32> to vector<2x32xf32>
    %234 = arith.mulf %227, %214 : vector<2x32xf32>
    %235 = arith.mulf %226, %232 : vector<2x32xf32>
    %236 = arith.addf %234, %235 : vector<2x32xf32>
    %237 = math.tanh %236 : vector<2x32xf32>
    %238 = arith.mulf %233, %237 : vector<2x32xf32>
    %239 = vector.extract_strided_slice %192 {offsets = [4, 0], sizes = [2, 128], strides = [1, 1]} : vector<16x128xf32> to vector<2x128xf32>
    %240 = arith.truncf %238 : vector<2x32xf32> to vector<2x32xbf16>
    %cst_58 = arith.constant dense<0.000000e+00> : vector<2x128xf32>
    %241 = tpu.matmul %240, %188, %cst_58 {dimension_numbers = #tpu.dot_dimension_numbers<[1], [0], [0], [1], [0, 0, 1, 1], [], []>} : vector<2x32xbf16>, vector<32x128xbf16>, vector<2x128xf32> -> vector<2x128xf32>
    %242 = arith.addf %239, %241 : vector<2x128xf32>
    %243 = arith.negf %242 : vector<2x128xf32>
    %244 = math.exp %243 : vector<2x128xf32>
    %cst_59 = arith.constant 1.000000e+00 : f32
    %245 = vector.broadcast %cst_59 : f32 to vector<2x128xf32>
    %246 = arith.addf %245, %244 : vector<2x128xf32>
    %247 = arith.divf %245, %246 : vector<2x128xf32>
    %248 = vector.extract_strided_slice %247 {offsets = [0, 0], sizes = [2, 32], strides = [1, 1]} : vector<2x128xf32> to vector<2x32xf32>
    %249 = vector.extract_strided_slice %247 {offsets = [0, 32], sizes = [2, 32], strides = [1, 1]} : vector<2x128xf32> to vector<2x32xf32>
    %250 = vector.extract_strided_slice %247 {offsets = [0, 64], sizes = [2, 32], strides = [1, 1]} : vector<2x128xf32> to vector<2x32xf32>
    %cst_60 = arith.constant 2.000000e+00 : f32
    %251 = vector.broadcast %cst_60 : f32 to vector<2x32xf32>
    %252 = arith.mulf %251, %250 : vector<2x32xf32>
    %cst_61 = arith.constant 1.000000e+00 : f32
    %253 = vector.broadcast %cst_61 : f32 to vector<2x32xf32>
    %254 = arith.subf %252, %253 : vector<2x32xf32>
    %255 = vector.extract_strided_slice %247 {offsets = [0, 96], sizes = [2, 32], strides = [1, 1]} : vector<2x128xf32> to vector<2x32xf32>
    %256 = arith.mulf %249, %236 : vector<2x32xf32>
    %257 = arith.mulf %248, %254 : vector<2x32xf32>
    %258 = arith.addf %256, %257 : vector<2x32xf32>
    %259 = math.tanh %258 : vector<2x32xf32>
    %260 = arith.mulf %255, %259 : vector<2x32xf32>
    %261 = vector.extract_strided_slice %192 {offsets = [6, 0], sizes = [2, 128], strides = [1, 1]} : vector<16x128xf32> to vector<2x128xf32>
    %262 = arith.truncf %260 : vector<2x32xf32> to vector<2x32xbf16>
    %cst_62 = arith.constant dense<0.000000e+00> : vector<2x128xf32>
    %263 = tpu.matmul %262, %188, %cst_62 {dimension_numbers = #tpu.dot_dimension_numbers<[1], [0], [0], [1], [0, 0, 1, 1], [], []>} : vector<2x32xbf16>, vector<32x128xbf16>, vector<2x128xf32> -> vector<2x128xf32>
    %264 = arith.addf %261, %263 : vector<2x128xf32>
    %265 = arith.negf %264 : vector<2x128xf32>
    %266 = math.exp %265 : vector<2x128xf32>
    %cst_63 = arith.constant 1.000000e+00 : f32
    %267 = vector.broadcast %cst_63 : f32 to vector<2x128xf32>
    %268 = arith.addf %267, %266 : vector<2x128xf32>
    %269 = arith.divf %267, %268 : vector<2x128xf32>
    %270 = vector.extract_strided_slice %269 {offsets = [0, 0], sizes = [2, 32], strides = [1, 1]} : vector<2x128xf32> to vector<2x32xf32>
    %271 = vector.extract_strided_slice %269 {offsets = [0, 32], sizes = [2, 32], strides = [1, 1]} : vector<2x128xf32> to vector<2x32xf32>
    %272 = vector.extract_strided_slice %269 {offsets = [0, 64], sizes = [2, 32], strides = [1, 1]} : vector<2x128xf32> to vector<2x32xf32>
    %cst_64 = arith.constant 2.000000e+00 : f32
    %273 = vector.broadcast %cst_64 : f32 to vector<2x32xf32>
    %274 = arith.mulf %273, %272 : vector<2x32xf32>
    %cst_65 = arith.constant 1.000000e+00 : f32
    %275 = vector.broadcast %cst_65 : f32 to vector<2x32xf32>
    %276 = arith.subf %274, %275 : vector<2x32xf32>
    %277 = vector.extract_strided_slice %269 {offsets = [0, 96], sizes = [2, 32], strides = [1, 1]} : vector<2x128xf32> to vector<2x32xf32>
    %278 = arith.mulf %271, %258 : vector<2x32xf32>
    %279 = arith.mulf %270, %276 : vector<2x32xf32>
    %280 = arith.addf %278, %279 : vector<2x32xf32>
    %281 = math.tanh %280 : vector<2x32xf32>
    %282 = arith.mulf %277, %281 : vector<2x32xf32>
    %283 = vector.extract_strided_slice %192 {offsets = [8, 0], sizes = [2, 128], strides = [1, 1]} : vector<16x128xf32> to vector<2x128xf32>
    %284 = arith.truncf %282 : vector<2x32xf32> to vector<2x32xbf16>
    %cst_66 = arith.constant dense<0.000000e+00> : vector<2x128xf32>
    %285 = tpu.matmul %284, %188, %cst_66 {dimension_numbers = #tpu.dot_dimension_numbers<[1], [0], [0], [1], [0, 0, 1, 1], [], []>} : vector<2x32xbf16>, vector<32x128xbf16>, vector<2x128xf32> -> vector<2x128xf32>
    %286 = arith.addf %283, %285 : vector<2x128xf32>
    %287 = arith.negf %286 : vector<2x128xf32>
    %288 = math.exp %287 : vector<2x128xf32>
    %cst_67 = arith.constant 1.000000e+00 : f32
    %289 = vector.broadcast %cst_67 : f32 to vector<2x128xf32>
    %290 = arith.addf %289, %288 : vector<2x128xf32>
    %291 = arith.divf %289, %290 : vector<2x128xf32>
    %292 = vector.extract_strided_slice %291 {offsets = [0, 0], sizes = [2, 32], strides = [1, 1]} : vector<2x128xf32> to vector<2x32xf32>
    %293 = vector.extract_strided_slice %291 {offsets = [0, 32], sizes = [2, 32], strides = [1, 1]} : vector<2x128xf32> to vector<2x32xf32>
    %294 = vector.extract_strided_slice %291 {offsets = [0, 64], sizes = [2, 32], strides = [1, 1]} : vector<2x128xf32> to vector<2x32xf32>
    %cst_68 = arith.constant 2.000000e+00 : f32
    %295 = vector.broadcast %cst_68 : f32 to vector<2x32xf32>
    %296 = arith.mulf %295, %294 : vector<2x32xf32>
    %cst_69 = arith.constant 1.000000e+00 : f32
    %297 = vector.broadcast %cst_69 : f32 to vector<2x32xf32>
    %298 = arith.subf %296, %297 : vector<2x32xf32>
    %299 = vector.extract_strided_slice %291 {offsets = [0, 96], sizes = [2, 32], strides = [1, 1]} : vector<2x128xf32> to vector<2x32xf32>
    %300 = arith.mulf %293, %280 : vector<2x32xf32>
    %301 = arith.mulf %292, %298 : vector<2x32xf32>
    %302 = arith.addf %300, %301 : vector<2x32xf32>
    %303 = math.tanh %302 : vector<2x32xf32>
    %304 = arith.mulf %299, %303 : vector<2x32xf32>
    %305 = vector.extract_strided_slice %192 {offsets = [10, 0], sizes = [2, 128], strides = [1, 1]} : vector<16x128xf32> to vector<2x128xf32>
    %306 = arith.truncf %304 : vector<2x32xf32> to vector<2x32xbf16>
    %cst_70 = arith.constant dense<0.000000e+00> : vector<2x128xf32>
    %307 = tpu.matmul %306, %188, %cst_70 {dimension_numbers = #tpu.dot_dimension_numbers<[1], [0], [0], [1], [0, 0, 1, 1], [], []>} : vector<2x32xbf16>, vector<32x128xbf16>, vector<2x128xf32> -> vector<2x128xf32>
    %308 = arith.addf %305, %307 : vector<2x128xf32>
    %309 = arith.negf %308 : vector<2x128xf32>
    %310 = math.exp %309 : vector<2x128xf32>
    %cst_71 = arith.constant 1.000000e+00 : f32
    %311 = vector.broadcast %cst_71 : f32 to vector<2x128xf32>
    %312 = arith.addf %311, %310 : vector<2x128xf32>
    %313 = arith.divf %311, %312 : vector<2x128xf32>
    %314 = vector.extract_strided_slice %313 {offsets = [0, 0], sizes = [2, 32], strides = [1, 1]} : vector<2x128xf32> to vector<2x32xf32>
    %315 = vector.extract_strided_slice %313 {offsets = [0, 32], sizes = [2, 32], strides = [1, 1]} : vector<2x128xf32> to vector<2x32xf32>
    %316 = vector.extract_strided_slice %313 {offsets = [0, 64], sizes = [2, 32], strides = [1, 1]} : vector<2x128xf32> to vector<2x32xf32>
    %cst_72 = arith.constant 2.000000e+00 : f32
    %317 = vector.broadcast %cst_72 : f32 to vector<2x32xf32>
    %318 = arith.mulf %317, %316 : vector<2x32xf32>
    %cst_73 = arith.constant 1.000000e+00 : f32
    %319 = vector.broadcast %cst_73 : f32 to vector<2x32xf32>
    %320 = arith.subf %318, %319 : vector<2x32xf32>
    %321 = vector.extract_strided_slice %313 {offsets = [0, 96], sizes = [2, 32], strides = [1, 1]} : vector<2x128xf32> to vector<2x32xf32>
    %322 = arith.mulf %315, %302 : vector<2x32xf32>
    %323 = arith.mulf %314, %320 : vector<2x32xf32>
    %324 = arith.addf %322, %323 : vector<2x32xf32>
    %325 = math.tanh %324 : vector<2x32xf32>
    %326 = arith.mulf %321, %325 : vector<2x32xf32>
    %327 = vector.extract_strided_slice %192 {offsets = [12, 0], sizes = [2, 128], strides = [1, 1]} : vector<16x128xf32> to vector<2x128xf32>
    %328 = arith.truncf %326 : vector<2x32xf32> to vector<2x32xbf16>
    %cst_74 = arith.constant dense<0.000000e+00> : vector<2x128xf32>
    %329 = tpu.matmul %328, %188, %cst_74 {dimension_numbers = #tpu.dot_dimension_numbers<[1], [0], [0], [1], [0, 0, 1, 1], [], []>} : vector<2x32xbf16>, vector<32x128xbf16>, vector<2x128xf32> -> vector<2x128xf32>
    %330 = arith.addf %327, %329 : vector<2x128xf32>
    %331 = arith.negf %330 : vector<2x128xf32>
    %332 = math.exp %331 : vector<2x128xf32>
    %cst_75 = arith.constant 1.000000e+00 : f32
    %333 = vector.broadcast %cst_75 : f32 to vector<2x128xf32>
    %334 = arith.addf %333, %332 : vector<2x128xf32>
    %335 = arith.divf %333, %334 : vector<2x128xf32>
    %336 = vector.extract_strided_slice %335 {offsets = [0, 0], sizes = [2, 32], strides = [1, 1]} : vector<2x128xf32> to vector<2x32xf32>
    %337 = vector.extract_strided_slice %335 {offsets = [0, 32], sizes = [2, 32], strides = [1, 1]} : vector<2x128xf32> to vector<2x32xf32>
    %338 = vector.extract_strided_slice %335 {offsets = [0, 64], sizes = [2, 32], strides = [1, 1]} : vector<2x128xf32> to vector<2x32xf32>
    %cst_76 = arith.constant 2.000000e+00 : f32
    %339 = vector.broadcast %cst_76 : f32 to vector<2x32xf32>
    %340 = arith.mulf %339, %338 : vector<2x32xf32>
    %cst_77 = arith.constant 1.000000e+00 : f32
    %341 = vector.broadcast %cst_77 : f32 to vector<2x32xf32>
    %342 = arith.subf %340, %341 : vector<2x32xf32>
    %343 = vector.extract_strided_slice %335 {offsets = [0, 96], sizes = [2, 32], strides = [1, 1]} : vector<2x128xf32> to vector<2x32xf32>
    %344 = arith.mulf %337, %324 : vector<2x32xf32>
    %345 = arith.mulf %336, %342 : vector<2x32xf32>
    %346 = arith.addf %344, %345 : vector<2x32xf32>
    %347 = math.tanh %346 : vector<2x32xf32>
    %348 = arith.mulf %343, %347 : vector<2x32xf32>
    %349 = vector.extract_strided_slice %192 {offsets = [14, 0], sizes = [2, 128], strides = [1, 1]} : vector<16x128xf32> to vector<2x128xf32>
    %350 = arith.truncf %348 : vector<2x32xf32> to vector<2x32xbf16>
    %cst_78 = arith.constant dense<0.000000e+00> : vector<2x128xf32>
    %351 = tpu.matmul %350, %188, %cst_78 {dimension_numbers = #tpu.dot_dimension_numbers<[1], [0], [0], [1], [0, 0, 1, 1], [], []>} : vector<2x32xbf16>, vector<32x128xbf16>, vector<2x128xf32> -> vector<2x128xf32>
    %352 = arith.addf %349, %351 : vector<2x128xf32>
    %353 = arith.negf %352 : vector<2x128xf32>
    %354 = math.exp %353 : vector<2x128xf32>
    %cst_79 = arith.constant 1.000000e+00 : f32
    %355 = vector.broadcast %cst_79 : f32 to vector<2x128xf32>
    %356 = arith.addf %355, %354 : vector<2x128xf32>
    %357 = arith.divf %355, %356 : vector<2x128xf32>
    %358 = vector.extract_strided_slice %357 {offsets = [0, 0], sizes = [2, 32], strides = [1, 1]} : vector<2x128xf32> to vector<2x32xf32>
    %359 = vector.extract_strided_slice %357 {offsets = [0, 32], sizes = [2, 32], strides = [1, 1]} : vector<2x128xf32> to vector<2x32xf32>
    %360 = vector.extract_strided_slice %357 {offsets = [0, 64], sizes = [2, 32], strides = [1, 1]} : vector<2x128xf32> to vector<2x32xf32>
    %cst_80 = arith.constant 2.000000e+00 : f32
    %361 = vector.broadcast %cst_80 : f32 to vector<2x32xf32>
    %362 = arith.mulf %361, %360 : vector<2x32xf32>
    %cst_81 = arith.constant 1.000000e+00 : f32
    %363 = vector.broadcast %cst_81 : f32 to vector<2x32xf32>
    %364 = arith.subf %362, %363 : vector<2x32xf32>
    %365 = vector.extract_strided_slice %357 {offsets = [0, 96], sizes = [2, 32], strides = [1, 1]} : vector<2x128xf32> to vector<2x32xf32>
    %366 = arith.mulf %359, %346 : vector<2x32xf32>
    %367 = arith.mulf %358, %364 : vector<2x32xf32>
    %368 = arith.addf %366, %367 : vector<2x32xf32>
    %369 = math.tanh %368 : vector<2x32xf32>
    %370 = arith.mulf %365, %369 : vector<2x32xf32>
    %371 = tpu.concatenate %216, %238, %260, %282, %304, %326, %348, %370 in 0 : vector<2x32xf32>, vector<2x32xf32>, vector<2x32xf32>, vector<2x32xf32>, vector<2x32xf32>, vector<2x32xf32>, vector<2x32xf32>, vector<2x32xf32> -> vector<16x32xf32>
    %c0_82 = arith.constant 0 : index
    %c0_83 = arith.constant 0 : index
    %372 = vector.load %arg7[%c0_82, %c0_83] : memref<1x32xf32, #tpu.memory_space<vmem>>, vector<1x32xf32>
    %373 = vector.broadcast %372 : vector<1x32xf32> to vector<16x32xf32>
    %374 = arith.mulf %371, %373 : vector<16x32xf32>
    %cst_84 = arith.constant dense<0.000000e+00> : vector<16xf32>
    %375 = vector.multi_reduction <add>, %374, %cst_84 [1] : vector<16x32xf32> to vector<16xf32>
    %376 = vector.shape_cast %375 : vector<16xf32> to vector<16x1xf32>
    %c0_85 = arith.constant 0 : index
    %c0_86 = arith.constant 0 : index
    %377 = vector.load %arg8[%c0_85, %c0_86] : memref<1x1xf32, #tpu.memory_space<vmem>>, vector<1x1xf32>
    %378 = vector.broadcast %377 : vector<1x1xf32> to vector<16x1xf32>
    %379 = arith.addf %376, %378 : vector<16x1xf32>
    %c0_87 = arith.constant 0 : index
    %c0_88 = arith.constant 0 : index
    %380 = vector.load %arg9[%c0_87, %c0_88] : memref<16x1xf32, #tpu.memory_space<vmem>>, vector<16x1xf32>
    tpu.vector_store %arg9[%c0_87, %c0_88], %379 {strides = array<i32>} : memref<16x1xf32, #tpu.memory_space<vmem>>, vector<16x1xf32>,
    return
  }
}

</mosaic_0001>

<bundles_post_ra>
// kernel: inf_base_lstm_forward.1
= control target key start
LH: loop header
LB: loop body
LE: loop exit
PB: predicated region body
PF: predicated region fallthrough
CT: control target
= control target key end

     0   :  { %s2275_s0 = inlined_call_operand.vmem [shape: bf16[16,16], index: 0, kind: input, shape index: {}]   ;;  %s2276_s1 = inlined_call_operand.vmem [shape: bf16[16,128], index: 1, kind: input, shape index: {}]   ;;  %s2277_s2 = inlined_call_operand.vmem [shape: bf16[32,128], index: 2, kind: input, shape index: {}]   ;;  %s2278_s3 = inlined_call_operand.vmem [shape: f32[1,128], index: 3, kind: input, shape index: {}]   ;;  %s2279_s4 = inlined_call_operand.vmem [shape: bf16[32,128], index: 4, kind: input, shape index: {}]   ;;  %s2280_s5 = inlined_call_operand.vmem [shape: bf16[32,128], index: 5, kind: input, shape index: {}]   ;;  %s2281_s6 = inlined_call_operand.vmem [shape: f32[1,128], index: 6, kind: input, shape index: {}]   ;;  %s2282_s7 = inlined_call_operand.hbm [shape: f32[1,32], index: 7, kind: input, shape index: {}]   ;;  %s2283_s8 = inlined_call_operand.<no memory space> [shape: f32[1,1], index: 8, kind: input, shape index: {}]   ;;  %s2284_s9 = inlined_call_operand.vmem [shape: f32[16,1], index: 9, kind: output, shape index: {}]  }
   0x1   :  { %v14_v0 = vstv %s2283_s8 }
   0x2   :  { %15 = vst [vmem:[#allocation2] sm:$0x1] %v14_v0 }
   0x3   :  { %16 = vsyncpa [#allocation4], 0  ;;  %s1910_s11 = smov [#allocation3]   ;;  %s1886_s15 = scalar_lea.hbm %s2282_s7, 16 }
   0x4   :  { %s37_s12 = sshll.u32 %s1910_s11, 4  ;;  %p1887_p0 = scmp.ne.s32.totalorder %s2282_s7, %s1886_s15  ;;  %s38_s12 = int_to_ptr.vmem [resolvable:$true] %s37_s12 }
   0x5   :  { %p1890_p1 = scmp.lt.u32.totalorder %s1886_s15, %s2282_s7 }
   0x7   :  { %p1892_p2 = pnand %p1890_p1, %p1887_p0 }
   0x9   :  { %1895 = shalt.err (!%p1892_p2)
}
   0xa   :  { %s1896_s8 = scalar_lea.vmem %s38_s12, 16  ;;  %s1900_s20 = scalar_lea.vmem %s38_s12, 32 }
   0xb   :  { %p1897_p3 = scmp.ne.s32.totalorder %s38_s12, %s1896_s8  ;;  %p1901_p4 = scmp.lt.s32.totalorder %s38_s12, %s38_s12 }
   0xc   :  { %p1902_p5 = scmp.lt.s32.totalorder %s1900_s20, %s1896_s8 }
   0xe   :  { %p1903_p6 = por %p1902_p5, %p1901_p4 }
  0x10   :  { %p1904_p7 = pnand %p1903_p6, %p1897_p3 }
  0x12   :  { %1907 = shalt.err (!%p1904_p7)
}
  0x13   :  { %40 = dma.hbm_to_vmem [thread:$0]  %s2282_s7, 16, %s38_s12, [#allocation4]  }
  0x14   :  { %1908 = dma.done.wait [#allocation4], 16  }
  0x15   :  { %1909 = vsyncadd [#allocation4], 4294967280  ;;  %v1911_v1 = vmov 0.0   ;;  %vm1912_vm0 = vmmov 0   ;;  %v1782_v2 = vld [vmem:[%s2276_s1] sm:$0xff]   ;;  %vm73_vm1 = vcmask 130048  }
  0x16   :  { %1633 = vmatprep.subr.bf16.mxu0 %v1911_v1  ;;  %1639 = vmatprep.subr.bf16.mxu1 %v1911_v1  ;;  %v1994_v3 = vld [vmem:[%s2277_s2] sm:$0xff]   ;;  %v2003_v5 = vld [vmem:[%s2277_s2 + $0x8] sm:$0xff]   ;;  %v1913_v6 = vmov 0   ;;  %s1914_s2 = smov 64   ;;  %vm130_vm2 = vcmask 261120   ;;  %vm755_vm3 = vcmask 1041408  }
  0x17   :  { %1635 = vmatprep.mubr.msk.bf16.mxu0 %vm1912_vm0, %v1911_v1  ;;  %1643 = vmatprep.mubr.msk.bf16.mxu1 %vm1912_vm0, %v1911_v1  ;;  %v1784_v4 = vld [vmem:[%s2275_s0] sm:$0xff]   ;;  %vm757_vm4 = vcmask 1043456   ;;  %vm759_vm5 = vcmask 1045504   ;;  %vm1512_vm6 = vcmask 7168  }
  0x18   :  { %1634 = vmatpush3.bf16.msra.mxu0 %v1782_v2  ;;  %1640 = vmatpush3.bf16.msra.mxu1 %v1994_v3  ;;  %v1520_v7 = vld [vmem:[%s2278_s3] ss:$0 sm:$0xff]  ;;  %s1915_s3 = smov 32  }
  0x19   :  { %1647 = vmatprep.subr.bf16.mxu0 %v1911_v1  ;;  %1641 = vmatprep.subr.bf16.mxu1 %v1911_v1 }
  0x1b   :  { %1636 = vmatmul.mubr.msk.bf16.vlgmr.msra.gmra.mrb[0].mxu0 %vm73_vm1, %v1784_v4 }
  0x1c   :  { %1648 = vmatpush3.bf16.msra.mxu0 %v1994_v3  ;;  %1651 = vmatprep.mubr.msk.bf16.mxu0 %vm1912_vm0, %v1911_v1 }
  0x1d   :  { %1642 = vmatpush3.bf16.msra.mxu1 %v2003_v5  ;;  %1649 = vmatprep.subr.bf16.mxu0 %v1911_v1 }
  0x1e   :  { %1655 = vmatprep.subr.bf16.mxu1 %v1911_v1 }
  0x20   :  { %1644 = vmatmul.mubr.bf16.vlgmr.msra.gmra.mrb[0].mxu1 %v1913_v6  ;;  %1650 = vmatpush3.bf16.msra.mxu0 %v2003_v5 }
  0x21   :  { %1656 = vmatpush3.bf16.msra.mxu1 %v1994_v3  ;;  %1659 = vmatprep.mubr.msk.bf16.mxu1 %vm1912_vm0, %v1911_v1 }
  0x22   :  { %1657 = vmatprep.subr.bf16.mxu1 %v1911_v1  ;;  %1663 = vmatprep.subr.bf16.mxu0 %v1911_v1 }
  0x25   :  { %1658 = vmatpush3.bf16.msra.mxu1 %v2003_v5 }
  0x26   :  { %1671 = vmatprep.subr.bf16.mxu1 %v1911_v1 }
  0xee   :  { %v111_v8 = vpop.f32.mrb[0].mxu0 }
  0xef   :  { %v1637_v9 = vpop.f32.mrb[1].mxu0  ;;  %v2025_v10 = vadd.f32 %v1520_v7, %v111_v8 }
  0xf0   :  { %v114_v11 = vpop.f32.mrb[2].mxu0 }
  0xf1   :  { %v2027_v12 = vadd.f32 %v1520_v7, %v114_v11  ;;  %v1638_v13 = vpop.f32.mrb[3].mxu0 }
  0xf3   :  { %v168_v14 = vpop.f32.mrb[0].mxu1 }
  0xf4   :  { %v174_v15 = vadd.f32 %v168_v14, %v2025_v10  ;;  %v1645_v16 = vpop.f32.mrb[1].mxu1 }
  0xf5   :  { %v171_v17 = vpop.f32.mrb[2].mxu1 }
  0xf6   :  { %v1526_v18 = vmul.f32 -1.442695, %v174_v15  ;;  %v1646_v19 = vpop.f32.mrb[3].mxu1 }
  0xf8   :  { %1790 = vpow2.f32 %v1526_v18 }
 0x102   :  { %v1791_v20 = vpop.eup %1790 }
 0x103   :  { %v178_v21 = vadd.f32 1.0, %v1791_v20 }
 0x105   :  { %1792 = vrcp.f32 %v178_v21 }
 0x10f   :  { %v1793_v22 = vpop.eup %1792 }
 0x110   :  { %v181_v23 = vmul.f32 2.0, %v1793_v22  ;;  %v183_v27 = vmul.f32 0.0, %v1793_v22 }
 0x112   :  { %v1527_v24 = vadd.f32 -1.0, %v181_v23 }
 0x114   :  { %185 = vrot.lane.b32.xlu0 %v1527_v24, %s1914_s2 }
 0x186   :  { %v186_v25 = vpop.permute.xlu0 %185 }
 0x187   :  { %v188_v26 = vmul.f32 %v1793_v22, %v186_v25 }
 0x189   :  { %190 = vrot.lane.b32.xlu0 %v188_v26, %s1915_s3 }
 0x1fb   :  { %v191_v28 = vpop.permute.xlu0 %190 }
 0x1fc   :  { %v193_v29 = vadd.f32 %v191_v28, %v183_v27 }
 0x1fe   :  { %1794 = vtanh.f32 %v193_v29  ;;  %v260_v49 = vrot.slane %v193_v29, 6 }
 0x208   :  { %v1795_v30 = vpop.eup %1794 }
 0x209   :  { %196 = vrot.lane.b32.xlu1 %v1795_v30, %s1914_s2 }
 0x27b   :  { %v197_v31 = vpop.permute.xlu1 %196 }
 0x27c   :  { %v2033_v32 = vmul.f32 %v1793_v22, %v197_v31 }
 0x27e   :  { %v200_v33 = vpack.c.bf16 %v2033_v32, %v2033_v32 }
 0x280   :  { %202 = vrot.lane.b32.xlu1 %v200_v33, %s1915_s3 }
 0x2f2   :  { %v203_v34 = vpop.permute.xlu1 %202 }
 0x2f3   :  { %1652 = vmatmul.mubr.msk.bf16.vlgmr.msra.gmra.mrb[4].mxu0 %vm130_vm2, %v203_v34 }
 0x2f4   :  { %1664 = vmatpush3.bf16.msra.mxu0 %v1994_v3  ;;  %1667 = vmatprep.mubr.msk.bf16.mxu0 %vm1912_vm0, %v1911_v1 }
 0x2f5   :  { %1665 = vmatprep.subr.bf16.mxu0 %v1911_v1 }
 0x2f8   :  { %1666 = vmatpush3.bf16.msra.mxu0 %v2003_v5 }
 0x2f9   :  { %1679 = vmatprep.subr.bf16.mxu0 %v1911_v1 }
 0x3c6   :  { %v241_v35 = vpop.f32.mrb[4].mxu0 }
 0x3c7   :  { %v248_v36 = vrot.slane %v241_v35, 6  ;;  %v1653_v37 = vpop.f32.mrb[5].mxu0 }
 0x3c8   :  { %v244_v38 = vpop.f32.mrb[6].mxu0 }
 0x3c9   :  { %v250_v39 = vadd.f32 %v248_v36, %v2025_v10  ;;  %v1654_v40 = vpop.f32.mrb[7].mxu0 }
 0x3cb   :  { %v1529_v41 = vmul.f32 -1.442695, %v250_v39 }
 0x3cd   :  { %1796 = vpow2.f32 %v1529_v41 }
 0x3d7   :  { %v1797_v42 = vpop.eup %1796 }
 0x3d8   :  { %v254_v43 = vadd.f32 1.0, %v1797_v42 }
 0x3da   :  { %1798 = vrcp.f32 %v254_v43 }
 0x3e4   :  { %v1799_v44 = vpop.eup %1798 }
 0x3e5   :  { %v257_v45 = vmul.f32 2.0, %v1799_v44  ;;  %v262_v50 = vmul.f32 %v1799_v44, %v260_v49 }
 0x3e7   :  { %v1530_v46 = vadd.f32 -1.0, %v257_v45 }
 0x3e9   :  { %264 = vrot.lane.b32.xlu0 %v1530_v46, %s1914_s2 }
 0x45b   :  { %v265_v47 = vpop.permute.xlu0 %264 }
 0x45c   :  { %v267_v48 = vmul.f32 %v1799_v44, %v265_v47 }
 0x45e   :  { %269 = vrot.lane.b32.xlu1 %v267_v48, %s1915_s3 }
 0x4d0   :  { %v270_v51 = vpop.permute.xlu1 %269 }
 0x4d1   :  { %v272_v52 = vadd.f32 %v270_v51, %v262_v50 }
 0x4d3   :  { %1800 = vtanh.f32 %v272_v52  ;;  %v340_v15 = vrot.slane %v272_v52, 6 }
 0x4dd   :  { %v1801_v53 = vpop.eup %1800 }
 0x4de   :  { %275 = vrot.lane.b32.xlu0 %v1801_v53, %s1914_s2 }
 0x550   :  { %v276_v54 = vpop.permute.xlu0 %275 }
 0x551   :  { %v278_v55 = vmul.f32 %v1799_v44, %v276_v54 }
 0x553   :  { %v279_v56 = vpack.c.bf16 %v278_v55, %v278_v55  ;;  %v756_v22 = vsel %vm755_vm3, %v2033_v32, %v278_v55 }
 0x555   :  { %v281_v57 = vrot.slane %v279_v56, 1 }
 0x557   :  { %282 = vrot.lane.b32.xlu1 %v281_v57, %s1915_s3 }
 0x5c9   :  { %v283_v58 = vpop.permute.xlu1 %282 }
 0x5ca   :  { %1660 = vmatmul.mubr.msk.bf16.vlgmr.msra.gmra.mrb[4].mxu1 %vm130_vm2, %v283_v58 }
 0x5cb   :  { %1672 = vmatpush3.bf16.msra.mxu1 %v1994_v3  ;;  %1675 = vmatprep.mubr.msk.bf16.mxu1 %vm1912_vm0, %v1911_v1 }
 0x5cc   :  { %1673 = vmatprep.subr.bf16.mxu1 %v1911_v1 }
 0x5cf   :  { %1674 = vmatpush3.bf16.msra.mxu1 %v2003_v5 }
 0x5d0   :  { %1687 = vmatprep.subr.bf16.mxu1 %v1911_v1 }
 0x69d   :  { %v321_v59 = vpop.f32.mrb[4].mxu1 }
 0x69e   :  { %v328_v60 = vrot.slane %v321_v59, 4  ;;  %v1661_v61 = vpop.f32.mrb[5].mxu1 }
 0x69f   :  { %v324_v62 = vpop.f32.mrb[6].mxu1 }
 0x6a0   :  { %v330_v63 = vadd.f32 %v328_v60, %v2025_v10  ;;  %v1662_v0 = vpop.f32.mrb[7].mxu1 }
 0x6a2   :  { %v1532_v2 = vmul.f32 -1.442695, %v330_v63 }
 0x6a4   :  { %1802 = vpow2.f32 %v1532_v2 }
 0x6ae   :  { %v1803_v4 = vpop.eup %1802 }
 0x6af   :  { %v334_v7 = vadd.f32 1.0, %v1803_v4 }
 0x6b1   :  { %1804 = vrcp.f32 %v334_v7 }
 0x6bb   :  { %v1805_v8 = vpop.eup %1804 }
 0x6bc   :  { %v337_v9 = vmul.f32 2.0, %v1805_v8  ;;  %v342_v16 = vmul.f32 %v1805_v8, %v340_v15 }
 0x6be   :  { %v1533_v11 = vadd.f32 -1.0, %v337_v9 }
 0x6c0   :  { %344 = vrot.lane.b32.xlu0 %v1533_v11, %s1914_s2 }
 0x732   :  { %v345_v13 = vpop.permute.xlu0 %344 }
 0x733   :  { %v347_v14 = vmul.f32 %v1805_v8, %v345_v13 }
 0x735   :  { %349 = vrot.lane.b32.xlu1 %v347_v14, %s1915_s3 }
 0x7a7   :  { %v350_v17 = vpop.permute.xlu1 %349 }
 0x7a8   :  { %v352_v18 = vadd.f32 %v350_v17, %v342_v16 }
 0x7aa   :  { %1806 = vtanh.f32 %v352_v18  ;;  %v420_v41 = vrot.slane %v352_v18, 6 }
 0x7b4   :  { %v1807_v19 = vpop.eup %1806 }
 0x7b5   :  { %355 = vrot.lane.b32.xlu0 %v1807_v19, %s1914_s2 }
 0x827   :  { %v356_v20 = vpop.permute.xlu0 %355 }
 0x828   :  { %v358_v21 = vmul.f32 %v1805_v8, %v356_v20 }
 0x82a   :  { %v359_v23 = vpack.c.bf16 %v358_v21, %v358_v21  ;;  %v758_v24 = vsel %vm757_vm4, %v756_v22, %v358_v21 }
 0x82c   :  { %v361_v25 = vrot.slane %v359_v23, 2 }
 0x82e   :  { %362 = vrot.lane.b32.xlu1 %v361_v25, %s1915_s3 }
 0x8a0   :  { %v363_v26 = vpop.permute.xlu1 %362 }
 0x8a1   :  { %1668 = vmatmul.mubr.msk.bf16.vlgmr.msra.gmra.mrb[8].mxu0 %vm130_vm2, %v363_v26 }
 0x8a2   :  { %1680 = vmatpush3.bf16.msra.mxu0 %v1994_v3  ;;  %1683 = vmatprep.mubr.msk.bf16.mxu0 %vm1912_vm0, %v1911_v1 }
 0x8a3   :  { %1681 = vmatprep.subr.bf16.mxu0 %v1911_v1 }
 0x8a6   :  { %1682 = vmatpush3.bf16.msra.mxu0 %v2003_v5 }
 0x8a7   :  { %1695 = vmatprep.subr.bf16.mxu0 %v1911_v1 }
 0x974   :  { %v401_v27 = vpop.f32.mrb[8].mxu0 }
 0x975   :  { %v408_v28 = vrot.slane %v401_v27, 2  ;;  %v1669_v29 = vpop.f32.mrb[9].mxu0 }
 0x976   :  { %v404_v30 = vpop.f32.mrb[10].mxu0 }
 0x977   :  { %v410_v31 = vadd.f32 %v408_v28, %v2025_v10  ;;  %v1670_v32 = vpop.f32.mrb[11].mxu0 }
 0x979   :  { %v1535_v33 = vmul.f32 -1.442695, %v410_v31 }
 0x97b   :  { %1808 = vpow2.f32 %v1535_v33 }
 0x985   :  { %v1809_v34 = vpop.eup %1808 }
 0x986   :  { %v414_v35 = vadd.f32 1.0, %v1809_v34 }
 0x988   :  { %1810 = vrcp.f32 %v414_v35 }
 0x992   :  { %v1811_v36 = vpop.eup %1810 }
 0x993   :  { %v417_v37 = vmul.f32 2.0, %v1811_v36  ;;  %v422_v42 = vmul.f32 %v1811_v36, %v420_v41 }
 0x995   :  { %v1536_v38 = vadd.f32 -1.0, %v417_v37 }
 0x997   :  { %424 = vrot.lane.b32.xlu0 %v1536_v38, %s1914_s2 }
 0xa09   :  { %v425_v39 = vpop.permute.xlu0 %424 }
 0xa0a   :  { %v427_v40 = vmul.f32 %v1811_v36, %v425_v39 }
 0xa0c   :  { %429 = vrot.lane.b32.xlu1 %v427_v40, %s1915_s3 }
 0xa7e   :  { %v430_v43 = vpop.permute.xlu1 %429 }
 0xa7f   :  { %v432_v44 = vadd.f32 %v430_v43, %v422_v42 }
 0xa81   :  { %1812 = vtanh.f32 %v432_v44  ;;  %v497_v0 = vrot.slane %v432_v44, 6 }
 0xa8b   :  { %v1813_v10 = vpop.eup %1812 }
 0xa8c   :  { %435 = vrot.lane.b32.xlu0 %v1813_v10, %s1914_s2 }
 0xafe   :  { %v436_v45 = vpop.permute.xlu0 %435 }
 0xaff   :  { %v438_v46 = vmul.f32 %v1811_v36, %v436_v45 }
 0xb01   :  { %v439_v47 = vpack.c.bf16 %v438_v46, %v438_v46  ;;  %v2077_v48 = vsel %vm759_vm5, %v758_v24, %v438_v46 }
 0xb03   :  { %v441_v49 = vrot.slane %v439_v47, 3 }
 0xb05   :  { %442 = vrot.lane.b32.xlu1 %v441_v49, %s1915_s3 }
 0xb77   :  { %v443_v50 = vpop.permute.xlu1 %442 }
 0xb78   :  { %1676 = vmatmul.mubr.msk.bf16.vlgmr.msra.gmra.mrb[8].mxu1 %vm130_vm2, %v443_v50 }
 0xb79   :  { %1688 = vmatpush3.bf16.msra.mxu1 %v1994_v3  ;;  %1691 = vmatprep.mubr.msk.bf16.mxu1 %vm1912_vm0, %v1911_v1 }
 0xb7a   :  { %1689 = vmatprep.subr.bf16.mxu1 %v1911_v1 }
 0xb7d   :  { %1690 = vmatpush3.bf16.msra.mxu1 %v2003_v5 }
 0xb7e   :  { %1703 = vmatprep.subr.bf16.mxu1 %v1911_v1 }
 0xc4b   :  { %v481_v51 = vpop.f32.mrb[8].mxu1 }
 0xc4c   :  { %v487_v52 = vadd.f32 %v481_v51, %v2027_v12  ;;  %v1677_v53 = vpop.f32.mrb[9].mxu1 }
 0xc4d   :  { %v484_v54 = vpop.f32.mrb[10].mxu1 }
 0xc4e   :  { %v1538_v55 = vmul.f32 -1.442695, %v487_v52  ;;  %v1678_v56 = vpop.f32.mrb[11].mxu1 }
 0xc50   :  { %1814 = vpow2.f32 %v1538_v55 }
 0xc5a   :  { %v1815_v57 = vpop.eup %1814 }
 0xc5b   :  { %v491_v58 = vadd.f32 1.0, %v1815_v57 }
 0xc5d   :  { %1816 = vrcp.f32 %v491_v58 }
 0xc67   :  { %v1817_v59 = vpop.eup %1816 }
 0xc68   :  { %v494_v60 = vmul.f32 2.0, %v1817_v59  ;;  %v499_v2 = vmul.f32 %v1817_v59, %v497_v0 }
 0xc6a   :  { %v1539_v61 = vadd.f32 -1.0, %v494_v60 }
 0xc6c   :  { %501 = vrot.lane.b32.xlu0 %v1539_v61, %s1914_s2 }
 0xcde   :  { %v502_v62 = vpop.permute.xlu0 %501 }
 0xcdf   :  { %v504_v63 = vmul.f32 %v1817_v59, %v502_v62 }
 0xce1   :  { %506 = vrot.lane.b32.xlu1 %v504_v63, %s1915_s3 }
 0xd53   :  { %v507_v4 = vpop.permute.xlu1 %506 }
 0xd54   :  { %v509_v7 = vadd.f32 %v507_v4, %v499_v2 }
 0xd56   :  { %1818 = vtanh.f32 %v509_v7  ;;  %v576_v27 = vrot.slane %v509_v7, 6 }
 0xd60   :  { %v1819_v8 = vpop.eup %1818 }
 0xd61   :  { %512 = vrot.lane.b32.xlu0 %v1819_v8, %s1914_s2 }
 0xdd3   :  { %v513_v9 = vpop.permute.xlu0 %512 }
 0xdd4   :  { %v2091_v11 = vmul.f32 %v1817_v59, %v513_v9 }
 0xdd6   :  { %v516_v13 = vpack.c.bf16 %v2091_v11, %v2091_v11 }
 0xdd8   :  { %518 = vrot.lane.b32.xlu1 %v516_v13, %s1915_s3 }
 0xe4a   :  { %v519_v14 = vpop.permute.xlu1 %518 }
 0xe4b   :  { %1684 = vmatmul.mubr.msk.bf16.vlgmr.msra.gmra.mrb[12].mxu0 %vm130_vm2, %v519_v14 }
 0xe4c   :  { %1696 = vmatpush3.bf16.msra.mxu0 %v1994_v3  ;;  %1699 = vmatprep.mubr.msk.bf16.mxu0 %vm1912_vm0, %v1911_v1 }
 0xe4d   :  { %1697 = vmatprep.subr.bf16.mxu0 %v1911_v1 }
 0xe50   :  { %1698 = vmatpush3.bf16.msra.mxu0 %v2003_v5 }
 0xe51   :  { %1711 = vmatprep.subr.bf16.mxu0 %v1911_v1 }
 0xf1e   :  { %v557_v15 = vpop.f32.mrb[12].mxu0 }
 0xf1f   :  { %v564_v16 = vrot.slane %v557_v15, 6  ;;  %v1685_v17 = vpop.f32.mrb[13].mxu0 }
 0xf20   :  { %v560_v18 = vpop.f32.mrb[14].mxu0 }
 0xf21   :  { %v566_v19 = vadd.f32 %v564_v16, %v2027_v12  ;;  %v1686_v20 = vpop.f32.mrb[15].mxu0 }
 0xf23   :  { %v1541_v21 = vmul.f32 -1.442695, %v566_v19 }
 0xf25   :  { %1820 = vpow2.f32 %v1541_v21 }
 0xf2f   :  { %v1821_v22 = vpop.eup %1820 }
 0xf30   :  { %v570_v3 = vadd.f32 1.0, %v1821_v22 }
 0xf32   :  { %1822 = vrcp.f32 %v570_v3  ;;  %v2131_v3 = vld [vmem:[%s2280_s5] sm:$0xff]  }
 0xf3c   :  { %v1823_v23 = vpop.eup %1822 }
 0xf3d   :  { %v573_v24 = vmul.f32 2.0, %v1823_v23  ;;  %v578_v28 = vmul.f32 %v1823_v23, %v576_v27 }
 0xf3f   :  { %v1542_v25 = vadd.f32 -1.0, %v573_v24  ;;  %v2140_v24 = vld [vmem:[%s2280_s5 + $0x8] sm:$0xff]  }
 0xf41   :  { %580 = vrot.lane.b32.xlu0 %v1542_v25, %s1914_s2 }
 0xfb3   :  { %v581_v5 = vpop.permute.xlu0 %580 }
 0xfb4   :  { %v583_v26 = vmul.f32 %v1823_v23, %v581_v5 }
 0xfb6   :  { %585 = vrot.lane.b32.xlu1 %v583_v26, %s1915_s3 }
0x1028   :  { %v586_v29 = vpop.permute.xlu1 %585 }
0x1029   :  { %v588_v30 = vadd.f32 %v586_v29, %v578_v28 }
0x102b   :  { %1824 = vtanh.f32 %v588_v30  ;;  %v656_v51 = vrot.slane %v588_v30, 6 }
0x1035   :  { %v1825_v31 = vpop.eup %1824 }
0x1036   :  { %591 = vrot.lane.b32.xlu0 %v1825_v31, %s1914_s2 }
0x10a8   :  { %v592_v32 = vpop.permute.xlu0 %591 }
0x10a9   :  { %v594_v33 = vmul.f32 %v1823_v23, %v592_v32  ;;  %v1788_v23 = vld [vmem:[%s2279_s4 + $0x8] sm:$0xff]  }
0x10ab   :  { %v595_v34 = vpack.c.bf16 %v594_v33, %v594_v33  ;;  %v761_v58 = vsel %vm755_vm3, %v2091_v11, %v594_v33 }
0x10ad   :  { %v597_v35 = vrot.slane %v595_v34, 1 }
0x10af   :  { %598 = vrot.lane.b32.xlu1 %v597_v35, %s1915_s3 }
0x1121   :  { %v599_v36 = vpop.permute.xlu1 %598 }
0x1122   :  { %1692 = vmatmul.mubr.msk.bf16.vlgmr.msra.gmra.mrb[12].mxu1 %vm130_vm2, %v599_v36 }
0x1123   :  { %1707 = vmatprep.mubr.msk.bf16.mxu1 %vm1912_vm0, %v1911_v1 }
0x11f5   :  { %v637_v37 = vpop.f32.mrb[12].mxu1 }
0x11f6   :  { %v644_v38 = vrot.slane %v637_v37, 4  ;;  %v1693_v39 = vpop.f32.mrb[13].mxu1 }
0x11f7   :  { %v640_v40 = vpop.f32.mrb[14].mxu1 }
0x11f8   :  { %v646_v41 = vadd.f32 %v644_v38, %v2027_v12  ;;  %v1694_v42 = vpop.f32.mrb[15].mxu1 }
0x11fa   :  { %v1544_v43 = vmul.f32 -1.442695, %v646_v41 }
0x11fc   :  { %1826 = vpow2.f32 %v1544_v43 }
0x1206   :  { %v1827_v44 = vpop.eup %1826 }
0x1207   :  { %v650_v10 = vadd.f32 1.0, %v1827_v44 }
0x1209   :  { %1828 = vrcp.f32 %v650_v10 }
0x1213   :  { %v1829_v45 = vpop.eup %1828 }
0x1214   :  { %v653_v46 = vmul.f32 2.0, %v1829_v45  ;;  %v658_v52 = vmul.f32 %v1829_v45, %v656_v51 }
0x1216   :  { %v1545_v47 = vadd.f32 -1.0, %v653_v46 }
0x1218   :  { %660 = vrot.lane.b32.xlu0 %v1545_v47, %s1914_s2 }
0x128a   :  { %v661_v49 = vpop.permute.xlu0 %660 }
0x128b   :  { %v663_v50 = vmul.f32 %v1829_v45, %v661_v49 }
0x128d   :  { %665 = vrot.lane.b32.xlu1 %v663_v50, %s1915_s3 }
0x12ff   :  { %v666_v53 = vpop.permute.xlu1 %665 }
0x1300   :  { %v668_v54 = vadd.f32 %v666_v53, %v658_v52 }
0x1302   :  { %1830 = vtanh.f32 %v668_v54  ;;  %v736_v19 = vrot.slane %v668_v54, 6 }
0x130c   :  { %v1831_v55 = vpop.eup %1830 }
0x130d   :  { %671 = vrot.lane.b32.xlu0 %v1831_v55, %s1914_s2 }
0x137f   :  { %v672_v56 = vpop.permute.xlu0 %671 }
0x1380   :  { %v674_v57 = vmul.f32 %v1829_v45, %v672_v56 }
0x1382   :  { %v675_v59 = vpack.c.bf16 %v674_v57, %v674_v57  ;;  %v762_v60 = vsel %vm757_vm4, %v761_v58, %v674_v57 }
0x1384   :  { %v677_v61 = vrot.slane %v675_v59, 2 }
0x1386   :  { %678 = vrot.lane.b32.xlu1 %v677_v61, %s1915_s3 }
0x13f8   :  { %v679_v62 = vpop.permute.xlu1 %678 }
0x13f9   :  { %1700 = vmatmul.mubr.msk.bf16.vlgmr.msra.gmra.mrb[16].mxu0 %vm130_vm2, %v679_v62 }
0x13fa   :  { %1715 = vmatprep.mubr.msk.bf16.mxu0 %vm1912_vm0, %v1911_v1  ;;  %1712 = vmatpush3.bf16.msra.mxu0 %v2131_v3 }
0x13fb   :  { %1713 = vmatprep.subr.bf16.mxu0 %v1911_v1 }
0x13fe   :  { %1714 = vmatpush3.bf16.msra.mxu0 %v2140_v24 }
0x13ff   :  { %1727 = vmatprep.subr.bf16.mxu0 %v1911_v1 }
0x1401   :  { %1716 = vmatmul.mubr.bf16.vlgmr.msra.gmra.mrb[20].mxu0 %v1913_v6 }
0x1402   :  { %1728 = vmatpush3.bf16.msra.mxu0 %v2131_v3  ;;  %1731 = vmatprep.mubr.msk.bf16.mxu0 %vm1912_vm0, %v1911_v1 }
0x1403   :  { %1729 = vmatprep.subr.bf16.mxu0 %v1911_v1 }
0x1406   :  { %1730 = vmatpush3.bf16.msra.mxu0 %v2140_v24 }
0x1407   :  { %1743 = vmatprep.subr.bf16.mxu0 %v1911_v1 }
0x14cc   :  { %v717_v63 = vpop.f32.mrb[16].mxu0 }
0x14cd   :  { %v724_v0 = vrot.slane %v717_v63, 2  ;;  %v1701_v2 = vpop.f32.mrb[17].mxu0 }
0x14ce   :  { %v720_v4 = vpop.f32.mrb[18].mxu0 }
0x14cf   :  { %v726_v7 = vadd.f32 %v724_v0, %v2027_v12  ;;  %v1702_v8 = vpop.f32.mrb[19].mxu0  ;;  %v1786_v12 = vld [vmem:[%s2279_s4] sm:$0xff]  }
0x14d0   :  { %1704 = vmatpush3.bf16.msra.mxu1 %v1786_v12 }
0x14d1   :  { %v1547_v9 = vmul.f32 -1.442695, %v726_v7  ;;  %1705 = vmatprep.subr.bf16.mxu1 %v1911_v1 }
0x14d3   :  { %1832 = vpow2.f32 %v1547_v9 }
0x14d4   :  { %1706 = vmatpush3.bf16.msra.mxu1 %v1788_v23  ;;  %v885_v6 = vpop.f32.mrb[20].mxu0 }
0x14d5   :  { %1719 = vmatprep.subr.bf16.mxu1 %v1911_v1  ;;  %v1717_v29 = vpop.f32.mrb[21].mxu0 }
0x14d6   :  { %v888_v30 = vpop.f32.mrb[22].mxu0 }
0x14d7   :  { %v1718_v31 = vpop.f32.mrb[23].mxu0 }
0x14dd   :  { %v1833_v11 = vpop.eup %1832 }
0x14de   :  { %v730_v13 = vadd.f32 1.0, %v1833_v11 }
0x14e0   :  { %1834 = vrcp.f32 %v730_v13 }
0x14ea   :  { %v1835_v14 = vpop.eup %1834 }
0x14eb   :  { %v733_v15 = vmul.f32 2.0, %v1835_v14  ;;  %v738_v20 = vmul.f32 %v1835_v14, %v736_v19 }
0x14ed   :  { %v1548_v16 = vadd.f32 -1.0, %v733_v15 }
0x14ef   :  { %740 = vrot.lane.b32.xlu0 %v1548_v16, %s1914_s2 }
0x1561   :  { %v741_v17 = vpop.permute.xlu0 %740 }
0x1562   :  { %v743_v18 = vmul.f32 %v1835_v14, %v741_v17 }
0x1564   :  { %745 = vrot.lane.b32.xlu1 %v743_v18, %s1915_s3 }
0x15d6   :  { %v746_v21 = vpop.permute.xlu1 %745 }
0x15d7   :  { %v748_v22 = vadd.f32 %v746_v21, %v738_v20 }
0x15d9   :  { %1836 = vtanh.f32 %v748_v22 }
0x15e3   :  { %v1837_v25 = vpop.eup %1836 }
0x15e4   :  { %751 = vrot.lane.b32.xlu0 %v1837_v25, %s1914_s2 }
0x1656   :  { %v752_v5 = vpop.permute.xlu0 %751 }
0x1657   :  { %v754_v26 = vmul.f32 %v1835_v14, %v752_v5 }
0x1659   :  { %v763_v27 = vsel %vm759_vm5, %v762_v60, %v754_v26 }
0x165a   :  { %v764_v28 = vpack.c.bf16 %v763_v27, %v2077_v48  ;;  %v1549_v48 = vld [vmem:[%s2281_s6] ss:$0 sm:$0xff]  ;;  %s1916_s6 = smov 96  }
0x165c   :  { %781 = vrot.lane.b32.xlu1 %v764_v28, %s1915_s3 }
0x16ce   :  { %v782_v32 = vpop.permute.xlu1 %781 }
0x16cf   :  { %1708 = vmatmul.mubr.msk.bf16.vlgmr.msra.gmra.mrb[16].mxu1 %vm130_vm2, %v782_v32 }
0x16d0   :  { %1720 = vmatpush3.bf16.msra.mxu1 %v2131_v3  ;;  %1723 = vmatprep.mubr.msk.bf16.mxu1 %vm1912_vm0, %v1911_v1 }
0x16d1   :  { %1721 = vmatprep.subr.bf16.mxu1 %v1911_v1 }
0x16d4   :  { %1722 = vmatpush3.bf16.msra.mxu1 %v2140_v24 }
0x16d5   :  { %1735 = vmatprep.subr.bf16.mxu1 %v1911_v1 }
0x17a2   :  { %v832_v33 = vpop.f32.mrb[16].mxu1 }
0x17a3   :  { %v2168_v34 = vadd.f32 %v1549_v48, %v832_v33  ;;  %v1709_v35 = vpop.f32.mrb[17].mxu1 }
0x17a4   :  { %v835_v36 = vpop.f32.mrb[18].mxu1 }
0x17a5   :  { %v891_v37 = vadd.f32 %v885_v6, %v2168_v34  ;;  %v2171_v38 = vadd.f32 %v1549_v48, %v835_v36  ;;  %v1710_v39 = vpop.f32.mrb[19].mxu1 }
0x17a7   :  { %v1555_v40 = vmul.f32 -1.442695, %v891_v37 }
0x17a9   :  { %1838 = vpow2.f32 %v1555_v40 }
0x17b3   :  { %v1839_v41 = vpop.eup %1838 }
0x17b4   :  { %v895_v42 = vadd.f32 1.0, %v1839_v41 }
0x17b6   :  { %1840 = vrcp.f32 %v895_v42 }
0x17c0   :  { %v1841_v43 = vpop.eup %1840 }
0x17c1   :  { %v898_v44 = vmul.f32 2.0, %v1841_v43  ;;  %v900_v47 = vmul.f32 0.0, %v1841_v43 }
0x17c3   :  { %v1556_v10 = vadd.f32 -1.0, %v898_v44 }
0x17c5   :  { %902 = vrot.lane.b32.xlu0 %v1556_v10, %s1914_s2 }
0x1837   :  { %v903_v45 = vpop.permute.xlu0 %902 }
0x1838   :  { %v905_v46 = vmul.f32 %v1841_v43, %v903_v45 }
0x183a   :  { %907 = vrot.lane.b32.xlu1 %v905_v46, %s1915_s3 }
0x18ac   :  { %v908_v49 = vpop.permute.xlu1 %907 }
0x18ad   :  { %v910_v50 = vadd.f32 %v908_v49, %v900_v47 }
0x18af   :  { %1842 = vtanh.f32 %v910_v50  ;;  %v977_v11 = vrot.slane %v910_v50, 6 }
0x18b9   :  { %v1843_v51 = vpop.eup %1842 }
0x18ba   :  { %913 = vrot.lane.b32.xlu0 %v1843_v51, %s1914_s2 }
0x192c   :  { %v914_v52 = vpop.permute.xlu0 %913 }
0x192d   :  { %v2176_v53 = vmul.f32 %v1841_v43, %v914_v52 }
0x192f   :  { %v917_v54 = vpack.c.bf16 %v2176_v53, %v2176_v53 }
0x1931   :  { %919 = vrot.lane.b32.xlu1 %v917_v54, %s1915_s3 }
0x19a3   :  { %v920_v55 = vpop.permute.xlu1 %919 }
0x19a4   :  { %1724 = vmatmul.mubr.msk.bf16.vlgmr.msra.gmra.mrb[20].mxu1 %vm130_vm2, %v920_v55 }
0x19a5   :  { %1736 = vmatpush3.bf16.msra.mxu1 %v2131_v3  ;;  %1739 = vmatprep.mubr.msk.bf16.mxu1 %vm1912_vm0, %v1911_v1 }
0x19a6   :  { %1737 = vmatprep.subr.bf16.mxu1 %v1911_v1 }
0x19a9   :  { %1738 = vmatpush3.bf16.msra.mxu1 %v2140_v24 }
0x19aa   :  { %1751 = vmatprep.subr.bf16.mxu1 %v1911_v1 }
0x1a77   :  { %v958_v56 = vpop.f32.mrb[20].mxu1 }
0x1a78   :  { %v965_v57 = vrot.slane %v958_v56, 6  ;;  %v1725_v58 = vpop.f32.mrb[21].mxu1 }
0x1a79   :  { %v961_v59 = vpop.f32.mrb[22].mxu1 }
0x1a7a   :  { %v967_v60 = vadd.f32 %v965_v57, %v2168_v34  ;;  %v1726_v61 = vpop.f32.mrb[23].mxu1 }
0x1a7c   :  { %v1558_v62 = vmul.f32 -1.442695, %v967_v60 }
0x1a7e   :  { %1844 = vpow2.f32 %v1558_v62 }
0x1a88   :  { %v1845_v63 = vpop.eup %1844 }
0x1a89   :  { %v971_v0 = vadd.f32 1.0, %v1845_v63 }
0x1a8b   :  { %1846 = vrcp.f32 %v971_v0 }
0x1a95   :  { %v1847_v2 = vpop.eup %1846 }
0x1a96   :  { %v974_v4 = vmul.f32 2.0, %v1847_v2  ;;  %v979_v13 = vmul.f32 %v1847_v2, %v977_v11 }
0x1a98   :  { %v1559_v7 = vadd.f32 -1.0, %v974_v4 }
0x1a9a   :  { %981 = vrot.lane.b32.xlu0 %v1559_v7, %s1914_s2 }
0x1b0c   :  { %v982_v8 = vpop.permute.xlu0 %981 }
0x1b0d   :  { %v984_v9 = vmul.f32 %v1847_v2, %v982_v8 }
0x1b0f   :  { %986 = vrot.lane.b32.xlu1 %v984_v9, %s1915_s3 }
0x1b81   :  { %v987_v14 = vpop.permute.xlu1 %986 }
0x1b82   :  { %v989_v15 = vadd.f32 %v987_v14, %v979_v13 }
0x1b84   :  { %1848 = vtanh.f32 %v989_v15  ;;  %v1057_v33 = vrot.slane %v989_v15, 6 }
0x1b8e   :  { %v1849_v16 = vpop.eup %1848 }
0x1b8f   :  { %992 = vrot.lane.b32.xlu0 %v1849_v16, %s1914_s2 }
0x1c01   :  { %v993_v17 = vpop.permute.xlu0 %992 }
0x1c02   :  { %v995_v18 = vmul.f32 %v1847_v2, %v993_v17 }
0x1c04   :  { %v996_v19 = vpack.c.bf16 %v995_v18, %v995_v18  ;;  %v1472_v42 = vsel %vm755_vm3, %v2176_v53, %v995_v18 }
0x1c06   :  { %v998_v20 = vrot.slane %v996_v19, 1 }
0x1c08   :  { %999 = vrot.lane.b32.xlu1 %v998_v20, %s1915_s3 }
0x1c7a   :  { %v1000_v21 = vpop.permute.xlu1 %999 }
0x1c7b   :  { %1732 = vmatmul.mubr.msk.bf16.vlgmr.msra.gmra.mrb[24].mxu0 %vm130_vm2, %v1000_v21 }
0x1c7c   :  { %1744 = vmatpush3.bf16.msra.mxu0 %v2131_v3  ;;  %1747 = vmatprep.mubr.msk.bf16.mxu0 %vm1912_vm0, %v1911_v1 }
0x1c7d   :  { %1745 = vmatprep.subr.bf16.mxu0 %v1911_v1 }
0x1c80   :  { %1746 = vmatpush3.bf16.msra.mxu0 %v2140_v24 }
0x1c81   :  { %1759 = vmatprep.subr.bf16.mxu0 %v1911_v1 }
0x1d4e   :  { %v1038_v22 = vpop.f32.mrb[24].mxu0 }
0x1d4f   :  { %v1045_v12 = vrot.slane %v1038_v22, 4  ;;  %v1733_v23 = vpop.f32.mrb[25].mxu0 }
0x1d50   :  { %v1041_v25 = vpop.f32.mrb[26].mxu0 }
0x1d51   :  { %v1047_v5 = vadd.f32 %v1045_v12, %v2168_v34  ;;  %v1734_v26 = vpop.f32.mrb[27].mxu0 }
0x1d53   :  { %v1561_v27 = vmul.f32 -1.442695, %v1047_v5 }
0x1d55   :  { %1850 = vpow2.f32 %v1561_v27 }
0x1d5f   :  { %v1851_v28 = vpop.eup %1850 }
0x1d60   :  { %v1051_v6 = vadd.f32 1.0, %v1851_v28 }
0x1d62   :  { %1852 = vrcp.f32 %v1051_v6 }
0x1d6c   :  { %v1853_v29 = vpop.eup %1852 }
0x1d6d   :  { %v1054_v30 = vmul.f32 2.0, %v1853_v29  ;;  %v1059_v35 = vmul.f32 %v1853_v29, %v1057_v33 }
0x1d6f   :  { %v1562_v31 = vadd.f32 -1.0, %v1054_v30 }
0x1d71   :  { %1061 = vrot.lane.b32.xlu0 %v1562_v31, %s1914_s2 }
0x1de3   :  { %v1062_v32 = vpop.permute.xlu0 %1061 }
0x1de4   :  { %v1064_v48 = vmul.f32 %v1853_v29, %v1062_v32 }
0x1de6   :  { %1066 = vrot.lane.b32.xlu1 %v1064_v48, %s1915_s3 }
0x1e58   :  { %v1067_v36 = vpop.permute.xlu1 %1066 }
0x1e59   :  { %v1069_v37 = vadd.f32 %v1067_v36, %v1059_v35 }
0x1e5b   :  { %1854 = vtanh.f32 %v1069_v37  ;;  %v1137_v61 = vrot.slane %v1069_v37, 6 }
0x1e65   :  { %v1855_v39 = vpop.eup %1854 }
0x1e66   :  { %1072 = vrot.lane.b32.xlu0 %v1855_v39, %s1914_s2 }
0x1ed8   :  { %v1073_v40 = vpop.permute.xlu0 %1072 }
0x1ed9   :  { %v1075_v41 = vmul.f32 %v1853_v29, %v1073_v40 }
0x1edb   :  { %v1076_v43 = vpack.c.bf16 %v1075_v41, %v1075_v41  ;;  %v1473_v44 = vsel %vm757_vm4, %v1472_v42, %v1075_v41 }
0x1edd   :  { %v1078_v10 = vrot.slane %v1076_v43, 2 }
0x1edf   :  { %1079 = vrot.lane.b32.xlu1 %v1078_v10, %s1915_s3 }
0x1f51   :  { %v1080_v45 = vpop.permute.xlu1 %1079 }
0x1f52   :  { %1740 = vmatmul.mubr.msk.bf16.vlgmr.msra.gmra.mrb[24].mxu1 %vm130_vm2, %v1080_v45 }
0x1f53   :  { %1752 = vmatpush3.bf16.msra.mxu1 %v2131_v3  ;;  %1755 = vmatprep.mubr.msk.bf16.mxu1 %vm1912_vm0, %v1911_v1 }
0x1f54   :  { %1753 = vmatprep.subr.bf16.mxu1 %v1911_v1 }
0x1f57   :  { %1754 = vmatpush3.bf16.msra.mxu1 %v2140_v24 }
0x1f58   :  { %1767 = vmatprep.subr.bf16.mxu1 %v1911_v1 }
0x2025   :  { %v1118_v46 = vpop.f32.mrb[24].mxu1 }
0x2026   :  { %v1125_v47 = vrot.slane %v1118_v46, 2  ;;  %v1741_v49 = vpop.f32.mrb[25].mxu1 }
0x2027   :  { %v1121_v50 = vpop.f32.mrb[26].mxu1 }
0x2028   :  { %v1127_v51 = vadd.f32 %v1125_v47, %v2168_v34  ;;  %v1742_v52 = vpop.f32.mrb[27].mxu1 }
0x202a   :  { %v1564_v53 = vmul.f32 -1.442695, %v1127_v51 }
0x202c   :  { %1856 = vpow2.f32 %v1564_v53 }
0x2036   :  { %v1857_v54 = vpop.eup %1856 }
0x2037   :  { %v1131_v55 = vadd.f32 1.0, %v1857_v54 }
0x2039   :  { %1858 = vrcp.f32 %v1131_v55 }
0x2043   :  { %v1859_v56 = vpop.eup %1858 }
0x2044   :  { %v1134_v57 = vmul.f32 2.0, %v1859_v56  ;;  %v1139_v62 = vmul.f32 %v1859_v56, %v1137_v61 }
0x2046   :  { %v1565_v58 = vadd.f32 -1.0, %v1134_v57 }
0x2048   :  { %1141 = vrot.lane.b32.xlu0 %v1565_v58, %s1914_s2 }
0x20ba   :  { %v1142_v59 = vpop.permute.xlu0 %1141 }
0x20bb   :  { %v1144_v60 = vmul.f32 %v1859_v56, %v1142_v59 }
0x20bd   :  { %1146 = vrot.lane.b32.xlu1 %v1144_v60, %s1915_s3 }
0x212f   :  { %v1147_v63 = vpop.permute.xlu1 %1146 }
0x2130   :  { %v1149_v0 = vadd.f32 %v1147_v63, %v1139_v62 }
0x2132   :  { %1860 = vtanh.f32 %v1149_v0  ;;  %v1214_v5 = vrot.slane %v1149_v0, 6 }
0x213c   :  { %v1861_v34 = vpop.eup %1860 }
0x213d   :  { %1152 = vrot.lane.b32.xlu0 %v1861_v34, %s1914_s2 }
0x21af   :  { %v1153_v2 = vpop.permute.xlu0 %1152 }
0x21b0   :  { %v1155_v4 = vmul.f32 %v1859_v56, %v1153_v2 }
0x21b2   :  { %v1156_v7 = vpack.c.bf16 %v1155_v4, %v1155_v4  ;;  %v2220_v8 = vsel %vm759_vm5, %v1473_v44, %v1155_v4 }
0x21b4   :  { %v1158_v9 = vrot.slane %v1156_v7, 3 }
0x21b6   :  { %1159 = vrot.lane.b32.xlu1 %v1158_v9, %s1915_s3 }
0x2228   :  { %v1160_v11 = vpop.permute.xlu1 %1159 }
0x2229   :  { %1748 = vmatmul.mubr.msk.bf16.vlgmr.msra.gmra.mrb[28].mxu0 %vm130_vm2, %v1160_v11 }
0x222a   :  { %1760 = vmatpush3.bf16.msra.mxu0 %v2131_v3  ;;  %1763 = vmatprep.mubr.msk.bf16.mxu0 %vm1912_vm0, %v1911_v1 }
0x222b   :  { %1761 = vmatprep.subr.bf16.mxu0 %v1911_v1 }
0x222e   :  { %1762 = vmatpush3.bf16.msra.mxu0 %v2140_v24 }
0x22fc   :  { %v1198_v13 = vpop.f32.mrb[28].mxu0 }
0x22fd   :  { %v1204_v14 = vadd.f32 %v1198_v13, %v2171_v38  ;;  %v1749_v15 = vpop.f32.mrb[29].mxu0 }
0x22fe   :  { %v1201_v16 = vpop.f32.mrb[30].mxu0 }
0x22ff   :  { %v1567_v17 = vmul.f32 -1.442695, %v1204_v14  ;;  %v1750_v18 = vpop.f32.mrb[31].mxu0 }
0x2301   :  { %1862 = vpow2.f32 %v1567_v17 }
0x230b   :  { %v1863_v19 = vpop.eup %1862 }
0x230c   :  { %v1208_v20 = vadd.f32 1.0, %v1863_v19 }
0x230e   :  { %1864 = vrcp.f32 %v1208_v20 }
0x2318   :  { %v1865_v21 = vpop.eup %1864 }
0x2319   :  { %v1211_v22 = vmul.f32 2.0, %v1865_v21  ;;  %v1216_v26 = vmul.f32 %v1865_v21, %v1214_v5 }
0x231b   :  { %v1568_v12 = vadd.f32 -1.0, %v1211_v22 }
0x231d   :  { %1218 = vrot.lane.b32.xlu0 %v1568_v12, %s1914_s2 }
0x238f   :  { %v1219_v23 = vpop.permute.xlu0 %1218 }
0x2390   :  { %v1221_v25 = vmul.f32 %v1865_v21, %v1219_v23 }
0x2392   :  { %1223 = vrot.lane.b32.xlu1 %v1221_v25, %s1915_s3 }
0x2404   :  { %v1224_v27 = vpop.permute.xlu1 %1223 }
0x2405   :  { %v1226_v28 = vadd.f32 %v1224_v27, %v1216_v26 }
0x2407   :  { %1866 = vtanh.f32 %v1226_v28 }
0x2411   :  { %v1867_v6 = vpop.eup %1866 }
0x2412   :  { %1229 = vrot.lane.b32.xlu0 %v1867_v6, %s1914_s2 }
0x2484   :  { %v1230_v29 = vpop.permute.xlu0 %1229 }
0x2485   :  { %v2233_v30 = vmul.f32 %v1865_v21, %v1230_v29 }
0x2487   :  { %v1233_v31 = vpack.c.bf16 %v2233_v30, %v2233_v30 }
0x2489   :  { %1235 = vrot.lane.b32.xlu1 %v1233_v31, %s1915_s3 }
0x24fb   :  { %v1236_v32 = vpop.permute.xlu1 %1235 }
0x24fc   :  { %1756 = vmatmul.mubr.msk.bf16.vlgmr.msra.gmra.mrb[28].mxu1 %vm130_vm2, %v1236_v32 }
0x24fd   :  { %1768 = vmatpush3.bf16.msra.mxu1 %v2131_v3  ;;  %1771 = vmatprep.mubr.msk.bf16.mxu1 %vm1912_vm0, %v1911_v1 }
0x24fe   :  { %1769 = vmatprep.subr.bf16.mxu1 %v1911_v1 }
0x2501   :  { %1770 = vmatpush3.bf16.msra.mxu1 %v2140_v24  ;;  %v1293_v24 = vrot.slane %v1226_v28, 6 }
0x25cf   :  { %v1274_v48 = vpop.f32.mrb[28].mxu1 }
0x25d0   :  { %v1281_v33 = vrot.slane %v1274_v48, 6  ;;  %v1757_v35 = vpop.f32.mrb[29].mxu1 }
0x25d1   :  { %v1277_v36 = vpop.f32.mrb[30].mxu1  ;;  %v1578_v35 = vld [vmem:[#allocation3] ss:$0 sm:$0xff] }
0x25d2   :  { %v1283_v37 = vadd.f32 %v1281_v33, %v2171_v38  ;;  %v1758_v39 = vpop.f32.mrb[31].mxu1 }
0x25d4   :  { %v1570_v40 = vmul.f32 -1.442695, %v1283_v37 }
0x25d6   :  { %1868 = vpow2.f32 %v1570_v40 }
0x25e0   :  { %v1869_v41 = vpop.eup %1868 }
0x25e1   :  { %v1287_v42 = vadd.f32 1.0, %v1869_v41 }
0x25e3   :  { %1870 = vrcp.f32 %v1287_v42 }
0x25ed   :  { %v1871_v3 = vpop.eup %1870 }
0x25ee   :  { %v1290_v43 = vmul.f32 2.0, %v1871_v3  ;;  %v1295_v45 = vmul.f32 %v1871_v3, %v1293_v24 }
0x25f0   :  { %v1571_v44 = vadd.f32 -1.0, %v1290_v43 }
0x25f2   :  { %1297 = vrot.lane.b32.xlu0 %v1571_v44, %s1914_s2 }
0x2664   :  { %v1298_v1 = vpop.permute.xlu0 %1297 }
0x2665   :  { %v1300_v10 = vmul.f32 %v1871_v3, %v1298_v1 }
0x2667   :  { %1302 = vrot.lane.b32.xlu1 %v1300_v10, %s1915_s3 }
0x26d9   :  { %v1303_v46 = vpop.permute.xlu1 %1302 }
0x26da   :  { %v1305_v47 = vadd.f32 %v1303_v46, %v1295_v45 }
0x26dc   :  { %1872 = vtanh.f32 %v1305_v47  ;;  %v1373_v9 = vrot.slane %v1305_v47, 6  ;;  %v1579_v47 = vld [vmem:[#allocation2] ss:$0 sm:$0xff] }
0x26e6   :  { %v1873_v49 = vpop.eup %1872 }
0x26e7   :  { %1308 = vrot.lane.b32.xlu0 %v1873_v49, %s1914_s2 }
0x2759   :  { %v1309_v50 = vpop.permute.xlu0 %1308 }
0x275a   :  { %v1311_v51 = vmul.f32 %v1871_v3, %v1309_v50 }
0x275c   :  { %v1312_v52 = vpack.c.bf16 %v1311_v51, %v1311_v51  ;;  %v1475_v18 = vsel %vm755_vm3, %v2233_v30, %v1311_v51 }
0x275e   :  { %v1314_v53 = vrot.slane %v1312_v52, 1 }
0x2760   :  { %1315 = vrot.lane.b32.xlu1 %v1314_v53, %s1915_s3 }
0x27d2   :  { %v1316_v54 = vpop.permute.xlu1 %1315 }
0x27d3   :  { %1764 = vmatmul.mubr.msk.bf16.vlgmr.msra.gmra.mrb[32].mxu0 %vm130_vm2, %v1316_v54 }
0x28a6   :  { %v1354_v55 = vpop.f32.mrb[32].mxu0 }
0x28a7   :  { %v1361_v56 = vrot.slane %v1354_v55, 4  ;;  %v1765_v57 = vpop.f32.mrb[33].mxu0 }
0x28a8   :  { %v1357_v58 = vpop.f32.mrb[34].mxu0 }
0x28a9   :  { %v1363_v59 = vadd.f32 %v1361_v56, %v2171_v38  ;;  %v1766_v60 = vpop.f32.mrb[35].mxu0 }
0x28ab   :  { %v1573_v61 = vmul.f32 -1.442695, %v1363_v59 }
0x28ad   :  { %1874 = vpow2.f32 %v1573_v61 }
0x28b7   :  { %v1875_v62 = vpop.eup %1874 }
0x28b8   :  { %v1367_v63 = vadd.f32 1.0, %v1875_v62 }
0x28ba   :  { %1876 = vrcp.f32 %v1367_v63 }
0x28c4   :  { %v1877_v0 = vpop.eup %1876 }
0x28c5   :  { %v1370_v34 = vmul.f32 2.0, %v1877_v0  ;;  %v1375_v11 = vmul.f32 %v1877_v0, %v1373_v9 }
0x28c7   :  { %v1574_v2 = vadd.f32 -1.0, %v1370_v34 }
0x28c9   :  { %1377 = vrot.lane.b32.xlu0 %v1574_v2, %s1914_s2 }
0x293b   :  { %v1378_v4 = vpop.permute.xlu0 %1377 }
0x293c   :  { %v1380_v7 = vmul.f32 %v1877_v0, %v1378_v4 }
0x293e   :  { %1382 = vrot.lane.b32.xlu1 %v1380_v7, %s1915_s3 }
0x29b0   :  { %v1383_v13 = vpop.permute.xlu1 %1382 }
0x29b1   :  { %v1385_v14 = vadd.f32 %v1383_v13, %v1375_v11 }
0x29b3   :  { %1878 = vtanh.f32 %v1385_v14  ;;  %v1453_v36 = vrot.slane %v1385_v14, 6 }
0x29bd   :  { %v1879_v15 = vpop.eup %1878 }
0x29be   :  { %1388 = vrot.lane.b32.xlu0 %v1879_v15, %s1914_s2 }
0x2a30   :  { %v1389_v16 = vpop.permute.xlu0 %1388 }
0x2a31   :  { %v1391_v17 = vmul.f32 %v1877_v0, %v1389_v16 }
0x2a33   :  { %v1392_v19 = vpack.c.bf16 %v1391_v17, %v1391_v17  ;;  %v1476_v20 = vsel %vm757_vm4, %v1475_v18, %v1391_v17 }
0x2a35   :  { %v1394_v21 = vrot.slane %v1392_v19, 2 }
0x2a37   :  { %1395 = vrot.lane.b32.xlu1 %v1394_v21, %s1915_s3 }
0x2aa9   :  { %v1396_v22 = vpop.permute.xlu1 %1395 }
0x2aaa   :  { %1772 = vmatmul.mubr.msk.bf16.vlgmr.msra.gmra.mrb[32].mxu1 %vm130_vm2, %v1396_v22 }
0x2b7d   :  { %v1434_v12 = vpop.f32.mrb[32].mxu1 }
0x2b7e   :  { %v1441_v23 = vrot.slane %v1434_v12, 2  ;;  %v1773_v25 = vpop.f32.mrb[33].mxu1 }
0x2b7f   :  { %v1437_v5 = vpop.f32.mrb[34].mxu1 }
0x2b80   :  { %v1443_v26 = vadd.f32 %v1441_v23, %v2171_v38  ;;  %v1774_v27 = vpop.f32.mrb[35].mxu1 }
0x2b82   :  { %v1576_v28 = vmul.f32 -1.442695, %v1443_v26 }
0x2b84   :  { %1880 = vpow2.f32 %v1576_v28 }
0x2b8e   :  { %v1881_v6 = vpop.eup %1880 }
0x2b8f   :  { %v1447_v29 = vadd.f32 1.0, %v1881_v6 }
0x2b91   :  { %1882 = vrcp.f32 %v1447_v29 }
0x2b9b   :  { %v1883_v30 = vpop.eup %1882 }
0x2b9c   :  { %v1450_v31 = vmul.f32 2.0, %v1883_v30  ;;  %v1455_v38 = vmul.f32 %v1883_v30, %v1453_v36 }
0x2b9e   :  { %v1577_v32 = vadd.f32 -1.0, %v1450_v31 }
0x2ba0   :  { %1457 = vrot.lane.b32.xlu0 %v1577_v32, %s1914_s2 }
0x2c12   :  { %v1458_v48 = vpop.permute.xlu0 %1457 }
0x2c13   :  { %v1460_v33 = vmul.f32 %v1883_v30, %v1458_v48 }
0x2c15   :  { %1462 = vrot.lane.b32.xlu1 %v1460_v33, %s1915_s3 }
0x2c19   :  { %1484 = vrot.lane.b32.xlu1 %v1578_v35, %s1916_s6 }
0x2c87   :  { %v1463_v37 = vpop.permute.xlu1 %1462 }
0x2c88   :  { %v1465_v39 = vadd.f32 %v1463_v37, %v1455_v38 }
0x2c8a   :  { %1884 = vtanh.f32 %v1465_v39 }
0x2c8b   :  { %v1485_v41 = vpop.permute.xlu1 %1484 }
0x2c8c   :  { %v1487_v42 = vmul.f32 %v1485_v41, %v2220_v8 }
0x2c94   :  { %v1885_v40 = vpop.eup %1884 }
0x2c95   :  { %1468 = vrot.lane.b32.xlu0 %v1885_v40, %s1914_s2 }
0x2c99   :  { %1491 = vrot.lane.b32.xlu0 %v1487_v42, %s1915_s3 }
0x2d07   :  { %v1469_v3 = vpop.permute.xlu0 %1468 }
0x2d08   :  { %v1471_v43 = vmul.f32 %v1883_v30, %v1469_v3 }
0x2d0a   :  { %v1477_v44 = vsel %vm759_vm5, %v1476_v20, %v1471_v43 }
0x2d0b   :  { %v1492_v1 = vpop.permute.xlu0 %1491  ;;  %v1488_v10 = vmul.f32 %v1485_v41, %v1477_v44 }
0x2d0c   :  { %v1497_v24 = vsel %vm130_vm2, %v1492_v1, 0.0 }
0x2d0d   :  { %1493 = vrot.lane.b32.xlu1 %v1488_v10, %s1915_s3  ;;  %1498 = vadd.xlane.f32.xlu0 %v1497_v24 }
0x2d7f   :  { %v1494_v45 = vpop.permute.xlu1 %1493 }
0x2d80   :  { %v1500_v46 = vsel %vm130_vm2, %v1494_v45, 0.0 }
0x2d81   :  { %1501 = vadd.xlane.f32.xlu1 %v1500_v46 }
0x2d9a   :  { %v1499_v8 = vpop.xlane.xlu0 %1498 }
0x2d9b   :  { %v1510_v49 = vadd.f32 %v1579_v47, %v1499_v8 }
0x2d9d   :  { %1513 = vst.msk [vmem:[%s2284_s9] sm:$0xff] %vm1512_vm6, %v1510_v49 }
0x2e0e   :  { %v1502_v50 = vpop.xlane.xlu1 %1501 }
0x2e0f   :  { %v1511_v51 = vadd.f32 %v1579_v47, %v1502_v50 }
0x2e11   :  { %1514 = vst.msk [vmem:[%s2284_s9 + $0x8] sm:$0xff] %vm1512_vm6, %v1511_v51 }
0x2e12   :  { %1519 = vsyncpa [#allocation4], 1 }

</bundles_post_ra>
